<compile_context>
chip_gen: v7x
topology: tpu7x:2x2x1
jax: 0.10.0
libtpu: 0.0.40
codegen_flags: <defaults>
</compile_context>

<pallas_src>
import math

import jax
import jax.numpy as jnp
from jax import lax
from jax.experimental import pallas as pl
from jax.experimental.pallas import tpu as pltpu


def _pick_tile(length, target, align):
    """Largest `align`-aligned tile <= target that evenly divides `length`."""
    if length <= target:
        return length
    t = target - (target % align)
    while t >= align:
        if length % t == 0:
            return t
        t -= align
    return length  # see TODO above (cdiv grid + masked tail)


def _vmem_capacity_bytes():
    """Per-core VMEM capacity; conservative fallback if the query fails."""
    try:
        return int(pltpu.get_tpu_info().vmem_capacity_bytes)
    except Exception:
        return 64 << 20  # v7x per-TC budget; safe lower bound for v5e/v6e too


def _make_kernel(embed_size, heads, tq, tk, causal, has_mask2d):
    head_dim = embed_size // heads
    inv_scale = 1.0 / math.sqrt(float(embed_size))
    dn_qk = (((2,), (2,)), ((0,), (0,)))  # contract head_dim, batch over heads
    dn_pv = (((2,), (1,)), ((0,), (0,)))  # contract tk,       batch over heads

    def kernel(*refs):
        if has_mask2d:
            (q_ref, k_ref, v_ref, msk_ref, wo_ref, bo_ref,
             o_ref, m_scr, l_scr, acc_scr) = refs
        else:
            (q_ref, k_ref, v_ref, wo_ref, bo_ref,
             o_ref, m_scr, l_scr, acc_scr) = refs
            msk_ref = None

        ki = pl.program_id(2)

        @pl.when(ki == 0)
        def _init():
            m_scr[...] = jnp.full(m_scr.shape, -jnp.inf, jnp.float32)
            l_scr[...] = jnp.zeros(l_scr.shape, jnp.float32)
            acc_scr[...] = jnp.zeros(acc_scr.shape, jnp.float32)

        q = q_ref[0]  # (heads, tq, head_dim) bf16
        k = k_ref[0]  # (heads, tk, head_dim) bf16
        v = v_ref[0]  # (heads, tk, head_dim) bf16

        # All heads in one batched matmul (no per-head lane slicing); f32 acc.
        s = lax.dot_general(q, k, dn_qk, preferred_element_type=jnp.float32)

        # Mask applied BEFORE the scale, exactly like the PyTorch forward
        # (masked_fill(-1e20) then divide by sqrt(embed_size)).
        if causal:
            q0 = pl.program_id(1) * tq
            k0 = ki * tk
            row = lax.broadcasted_iota(jnp.int32, (tq, tk), 0) + q0
            col = lax.broadcasted_iota(jnp.int32, (tq, tk), 1) + k0
            keep = (row >= col)[None, :, :]
            s = jnp.where(keep, s, jnp.float32(-1e20))
        elif has_mask2d:
            keep = (msk_ref[...] != 0)[None, :, :]
            s = jnp.where(keep, s, jnp.float32(-1e20))

        s = s * inv_scale

        # Online softmax across the streamed Lk axis.
        m_prev = m_scr[...]
        m_new = jnp.maximum(m_prev, jnp.max(s, axis=-1, keepdims=True))
        alpha = jnp.exp(m_prev - m_new)
        p = jnp.exp(s - m_new)
        l_scr[...] = alpha * l_scr[...] + jnp.sum(p, axis=-1, keepdims=True)
        pv = lax.dot_general(p.astype(v.dtype), v, dn_pv,
                             preferred_element_type=jnp.float32)
        acc_scr[...] = alpha * acc_scr[...] + pv
        m_scr[...] = m_new

        @pl.when(ki == pl.num_programs(2) - 1)
        def _finalize():
            # Exact divide: the approx reciprocal is not on the critical slot
            # here and avoids eating into the comparison tolerance.
            head_out = acc_scr[...] * pl.reciprocal(l_scr[...], approx=False)
            head_out = head_out.astype(wo_ref.dtype)  # (heads, tq, head_dim)
            # Fold fc_out per head into a lane-dense (tq, E) result. Runs once
            # per q tile; heads is small & static so a Python loop is fine.
            out = jnp.zeros((tq, embed_size), jnp.float32)
            for h in range(heads):
                out = out + jnp.dot(head_out[h], wo_ref[h],
                                    preferred_element_type=jnp.float32)
            o_ref[0] = (out + bo_ref[...]).astype(o_ref.dtype)

    return kernel


def self_attention_pallas(values, keys, query, params, *, embed_size, heads,
                          causal=False, mask2d=None,
                          compute_dtype=jnp.bfloat16):
    """values/keys/query: (N, L, embed_size) f32.
    Mask options: causal=True (mask synthesized in-kernel, no mask DMA),
    mask2d=(Lq, Lk) array shared across batches/heads, or neither.
    Returns (N, Lq, embed_size) f32."""
    N, Lq, E = query.shape
    Lk = keys.shape[1]
    assert values.shape == (N, Lk, E) and keys.shape == (N, Lk, E)
    assert E == embed_size
    head_dim = embed_size // heads
    assert head_dim * heads == embed_size

    f32 = jnp.float32
    # --- Hoisted Q/K/V projections: plain XLA matmuls, computed ONCE (not per
    #     query tile), emitted head-major and cast to bf16 for the MXU. ---
    q4 = query.astype(f32).reshape(N, Lq, heads, head_dim)
    k4 = keys.astype(f32).reshape(N, Lk, heads, head_dim)
    v4 = values.astype(f32).reshape(N, Lk, heads, head_dim)
    q_p = jnp.einsum("nqhd,ed->nhqe", q4, params["wq"].astype(f32)).astype(compute_dtype)
    k_p = jnp.einsum("nkhd,ed->nhke", k4, params["wk"].astype(f32)).astype(compute_dtype)
    v_p = jnp.einsum("nkhd,ed->nhke", v4, params["wv"].astype(f32)).astype(compute_dtype)
    # fc_out weight pre-transposed and grouped by head: (heads, head_dim, E).
    wo_hd = params["wo"].T.astype(f32).reshape(heads, head_dim, E).astype(compute_dtype)
    bo2d = params["bo"].reshape(1, E).astype(f32)

    has_mask2d = (mask2d is not None) and not causal

    # --- Generation-aware tiling & scoped-VMEM budget. ---
    vmem_cap = _vmem_capacity_bytes()
    tq = _pick_tile(Lq, 256 if vmem_cap <= (64 << 20) else 512, 8)
    tk = _pick_tile(Lk, 512, 128 if has_mask2d else 8)
    n_q, n_k = Lq // tq, Lk // tk

    csz = jnp.dtype(compute_dtype).itemsize
    blk = (2 * heads * tq * head_dim * csz          # q tile, double-buffered
           + 2 * 2 * heads * tk * head_dim * csz    # k + v tiles, double-buffered
           + 2 * tq * E * 4                         # output tile, double-buffered
           + heads * head_dim * E * csz + E * 4     # wo + bias, single-buffered
           + heads * tq * (head_dim + 2) * 4)       # m / l / acc scratch
    if has_mask2d:
        blk += 2 * tq * tk                          # int8 mask tile
    work = 3 * heads * tq * tk * 4                  # scores / probs / temps
    vmem_limit = int(min(max(16 << 20, 2 * (blk + work)), (vmem_cap * 7) // 8))

    kernel = _make_kernel(embed_size, heads, tq, tk, causal, has_mask2d)

    def _build(single_buffer_consts):
        cw = {"pipeline_mode": pl.Buffered(1)} if single_buffer_consts else {}
        in_specs = [
            pl.BlockSpec((1, heads, tq, head_dim), lambda n, qi, ki: (n, 0, qi, 0)),
            pl.BlockSpec((1, heads, tk, head_dim), lambda n, qi, ki: (n, 0, ki, 0)),
            pl.BlockSpec((1, heads, tk, head_dim), lambda n, qi, ki: (n, 0, ki, 0)),
        ]
        args = [q_p, k_p, v_p]
        if has_mask2d:
            in_specs.append(pl.BlockSpec((tq, tk), lambda n, qi, ki: (qi, ki)))
            args.append(mask2d.astype(jnp.int8))    # 4x less mask DMA than int32
        in_specs.append(pl.BlockSpec((heads, head_dim, E),
                                     lambda n, qi, ki: (0, 0, 0), **cw))
        in_specs.append(pl.BlockSpec((1, E), lambda n, qi, ki: (0, 0), **cw))
        args += [wo_hd, bo2d]

        call = pl.pallas_call(
            kernel,
            out_shape=jax.ShapeDtypeStruct((N, Lq, E), jnp.float32),
            grid_spec=pltpu.PrefetchScalarGridSpec(
                num_scalar_prefetch=0,
                grid=(N, n_q, n_k),
                in_specs=in_specs,
                out_specs=pl.BlockSpec((1, tq, E), lambda n, qi, ki: (n, qi, 0)),
                scratch_shapes=[
                    pltpu.VMEM((heads, tq, 1), jnp.float32),         # running max
                    pltpu.VMEM((heads, tq, 1), jnp.float32),         # running sum
                    pltpu.VMEM((heads, tq, head_dim), jnp.float32),  # output acc
                ]),
            compiler_params=pltpu.CompilerParams(
                dimension_semantics=("parallel", "parallel", "arbitrary"),
                vmem_limit_bytes=vmem_limit),
        )
        return call, args

    try:
        call, args = _build(True)
        return call(*args)
    except Exception:
        # Fallback if this JAX build rejects pl.Buffered(1) on constant inputs.
        call, args = _build(False)
        return call(*args)


def self_attention_ref(values, keys, query, mask, params, *, embed_size, heads):
    """Pure-JAX f32 reference mirroring the PyTorch forward exactly."""
    N, Lq, E = query.shape
    Lk = keys.shape[1]
    head_dim = embed_size // heads
    v = values.reshape(N, Lk, heads, head_dim)
    k = keys.reshape(N, Lk, heads, head_dim)
    q = query.reshape(N, Lq, heads, head_dim)
    v = jnp.einsum("nlhd,ed->nlhe", v, params["wv"])
    k = jnp.einsum("nlhd,ed->nlhe", k, params["wk"])
    q = jnp.einsum("nqhd,ed->nqhe", q, params["wq"])
    energy = jnp.einsum("nqhd,nkhd->nhqk", q, k)
    if mask is not None:
        energy = jnp.where(mask == 0, jnp.float32(-1e20), energy)
    attn = jax.nn.softmax(energy / math.sqrt(embed_size), axis=3)
    out = jnp.einsum("nhql,nlhd->nqhd", attn, v).reshape(N, Lq, embed_size)
    return jnp.einsum("nqe,fe->nqf", out, params["wo"]) + params["bo"]


if __name__ == "__main__":
    embed_size = 32
    heads = 2
    head_dim = embed_size // heads
    N, L = 2, 8

    key = jax.random.PRNGKey(0)
    ks = jax.random.split(key, 8)

    # Deterministic parameter init (nn.Linear weight shape = (out, in)).
    params = {
        "wq": jax.random.normal(ks[0], (head_dim, head_dim), jnp.float32) * 0.1,
        "wk": jax.random.normal(ks[1], (head_dim, head_dim), jnp.float32) * 0.1,
        "wv": jax.random.normal(ks[2], (head_dim, head_dim), jnp.float32) * 0.1,
        "wo": jax.random.normal(ks[3], (embed_size, embed_size), jnp.float32) * 0.1,
        "bo": jax.random.normal(ks[4], (embed_size,), jnp.float32) * 0.1,
    }

    values = jax.random.normal(ks[5], (N, L, embed_size), jnp.float32)
    keys_in = jax.random.normal(ks[6], (N, L, embed_size), jnp.float32)
    query = jax.random.normal(ks[7], (N, L, embed_size), jnp.float32)

    # Pallas kernel: causal mask synthesized in-kernel (no mask DMA).
    out = self_attention_pallas(values, keys_in, query, params,
                                embed_size=embed_size, heads=heads,
                                causal=True)
    out = jax.block_until_ready(out)

    # Reference gets the full (N, heads, Lq, Lk) causal mask, mirroring the
    # PyTorch module's mask argument.
    causal = jnp.tril(jnp.ones((L, L), jnp.int32))
    mask4d = jnp.broadcast_to(causal, (N, heads, L, L))
    ref = self_attention_ref(values, keys_in, query, mask4d, params,
                             embed_size=embed_size, heads=heads)

    assert out.shape == (N, L, embed_size)
    # bf16 MXU operands (f32 accumulation) => compare at bf16-level tolerance.
    assert jnp.allclose(out, ref, atol=2e-2, rtol=2e-2), "mismatch vs reference"

    print("KERNEL_OK")
</pallas_src>

<mosaic_0001>
module attributes {stable_mosaic.version = 11 : i64} {
  func.func @kernel(%arg0: i32, %arg1: i32, %arg2: i32, %arg3: memref<1x2x8x16xbf16, #tpu.memory_space<vmem>>, %arg4: memref<1x2x8x16xbf16, #tpu.memory_space<vmem>>, %arg5: memref<1x2x8x16xbf16, #tpu.memory_space<vmem>>, %arg6: memref<2x16x32xbf16, #tpu.memory_space<vmem>>, %arg7: memref<1x32xf32, #tpu.memory_space<vmem>>, %arg8: memref<1x8x32xf32, #tpu.memory_space<vmem>>, %arg9: memref<2x8x1xf32, #tpu.memory_space<vmem>>, %arg10: memref<2x8x1xf32, #tpu.memory_space<vmem>>, %arg11: memref<2x8x16xf32, #tpu.memory_space<vmem>>) attributes {dimension_semantics = [#tpu.dimension_semantics<parallel>, #tpu.dimension_semantics<parallel>, #tpu.dimension_semantics<arbitrary>], iteration_bounds = array<i64: 2, 1, 1>, scalar_prefetch = 0 : i64, scratch_operands = 3 : i64, tpu.core_type = #tpu.core_type<tc>, window_params = [{transform_indices = @transform_0, window_bounds = array<i64: 1, 2, 8, 16>}, {transform_indices = @transform_1, window_bounds = array<i64: 1, 2, 8, 16>}, {transform_indices = @transform_2, window_bounds = array<i64: 1, 2, 8, 16>}, {pipeline_mode = #tpu.pipeline_mode<synchronous>, transform_indices = @transform_3, window_bounds = array<i64: 2, 16, 32>}, {pipeline_mode = #tpu.pipeline_mode<synchronous>, transform_indices = @transform_4, window_bounds = array<i64: 1, 32>}, {transform_indices = @transform_5, window_bounds = array<i64: 1, 8, 32>}]} {
    %c0_i32 = arith.constant 0 : i32
    %0 = arith.cmpi eq, %arg2, %c0_i32 : i32
    %1 = arith.extui %0 : i1 to i32
    %c0_i32_0 = arith.constant 0 : i32
    %2 = arith.cmpi ne, %1, %c0_i32_0 : i32
    scf.if %2 {
      %cst_38 = arith.constant 0xFF800000 : f32
      %52 = vector.broadcast %cst_38 : f32 to vector<2x8x1xf32>
      %c0_39 = arith.constant 0 : index
      %c0_40 = arith.constant 0 : index
      %c0_41 = arith.constant 0 : index
      %53 = vector.load %arg9[%c0_39, %c0_40, %c0_41] : memref<2x8x1xf32, #tpu.memory_space<vmem>>, vector<2x8x1xf32>
      tpu.vector_store %arg9[%c0_39, %c0_40, %c0_41], %52 {strides = array<i32>} : memref<2x8x1xf32, #tpu.memory_space<vmem>>, vector<2x8x1xf32>,
      %cst_42 = arith.constant 0.000000e+00 : f32
      %54 = vector.broadcast %cst_42 : f32 to vector<2x8x1xf32>
      %c0_43 = arith.constant 0 : index
      %c0_44 = arith.constant 0 : index
      %c0_45 = arith.constant 0 : index
      %55 = vector.load %arg10[%c0_43, %c0_44, %c0_45] : memref<2x8x1xf32, #tpu.memory_space<vmem>>, vector<2x8x1xf32>
      tpu.vector_store %arg10[%c0_43, %c0_44, %c0_45], %54 {strides = array<i32>} : memref<2x8x1xf32, #tpu.memory_space<vmem>>, vector<2x8x1xf32>,
      %cst_46 = arith.constant 0.000000e+00 : f32
      %56 = vector.broadcast %cst_46 : f32 to vector<2x8x16xf32>
      %c0_47 = arith.constant 0 : index
      %c0_48 = arith.constant 0 : index
      %c0_49 = arith.constant 0 : index
      %57 = vector.load %arg11[%c0_47, %c0_48, %c0_49] : memref<2x8x16xf32, #tpu.memory_space<vmem>>, vector<2x8x16xf32>
      tpu.vector_store %arg11[%c0_47, %c0_48, %c0_49], %56 {strides = array<i32>} : memref<2x8x16xf32, #tpu.memory_space<vmem>>, vector<2x8x16xf32>,
    } else {
    }
    %c0 = arith.constant 0 : index
    %c0_1 = arith.constant 0 : index
    %c0_2 = arith.constant 0 : index
    %c0_3 = arith.constant 0 : index
    %3 = vector.load %arg3[%c0, %c0_1, %c0_2, %c0_3] : memref<1x2x8x16xbf16, #tpu.memory_space<vmem>>, vector<1x2x8x16xbf16>
    %4 = vector.shape_cast %3 : vector<1x2x8x16xbf16> to vector<2x8x16xbf16>
    %c0_4 = arith.constant 0 : index
    %c0_5 = arith.constant 0 : index
    %c0_6 = arith.constant 0 : index
    %c0_7 = arith.constant 0 : index
    %5 = vector.load %arg4[%c0_4, %c0_5, %c0_6, %c0_7] : memref<1x2x8x16xbf16, #tpu.memory_space<vmem>>, vector<1x2x8x16xbf16>
    %6 = vector.shape_cast %5 : vector<1x2x8x16xbf16> to vector<2x8x16xbf16>
    %c0_8 = arith.constant 0 : index
    %c0_9 = arith.constant 0 : index
    %c0_10 = arith.constant 0 : index
    %c0_11 = arith.constant 0 : index
    %7 = vector.load %arg5[%c0_8, %c0_9, %c0_10, %c0_11] : memref<1x2x8x16xbf16, #tpu.memory_space<vmem>>, vector<1x2x8x16xbf16>
    %8 = vector.shape_cast %7 : vector<1x2x8x16xbf16> to vector<2x8x16xbf16>
    %cst = arith.constant dense<0.000000e+00> : vector<2x8x8xf32>
    %9 = tpu.matmul %4, %6, %cst {dimension_numbers = #tpu.dot_dimension_numbers<[2], [2], [1], [1], [0, 0, 0, 1, 1, 1], [0], [0]>} : vector<2x8x16xbf16>, vector<2x8x16xbf16>, vector<2x8x8xf32> -> vector<2x8x8xf32>
    %c8_i32 = arith.constant 8 : i32
    %10 = arith.muli %arg1, %c8_i32 : i32
    %c8_i32_12 = arith.constant 8 : i32
    %11 = arith.muli %arg2, %c8_i32_12 : i32
    %12 = tpu.iota {dimensions = array<i32: 0>} : vector<8x8xi32>
    %13 = vector.broadcast %10 : i32 to vector<8x8xi32>
    %14 = arith.addi %12, %13 : vector<8x8xi32>
    %15 = tpu.iota {dimensions = array<i32: 1>} : vector<8x8xi32>
    %16 = vector.broadcast %11 : i32 to vector<8x8xi32>
    %17 = arith.addi %15, %16 : vector<8x8xi32>
    %18 = arith.cmpi sge, %14, %17 : vector<8x8xi32>
    %19 = vector.shape_cast %18 : vector<8x8xi1> to vector<1x8x8xi1>
    %cst_13 = arith.constant -1.000000e+20 : f32
    %20 = vector.shape_cast %19 : vector<1x8x8xi1> to vector<1x8x8xi1>
    %21 = vector.broadcast %20 : vector<1x8x8xi1> to vector<2x8x8xi1>
    %22 = vector.broadcast %cst_13 : f32 to vector<2x8x8xf32>
    %23 = arith.select %21, %9, %22 : vector<2x8x8xi1>, vector<2x8x8xf32>
    %cst_14 = arith.constant 0.176776692 : f32
    %24 = vector.broadcast %cst_14 : f32 to vector<2x8x8xf32>
    %25 = arith.mulf %23, %24 : vector<2x8x8xf32>
    %c0_15 = arith.constant 0 : index
    %c0_16 = arith.constant 0 : index
    %c0_17 = arith.constant 0 : index
    %26 = vector.load %arg9[%c0_15, %c0_16, %c0_17] : memref<2x8x1xf32, #tpu.memory_space<vmem>>, vector<2x8x1xf32>
    %cst_18 = arith.constant dense<0xFF800000> : vector<2x8xf32>
    %27 = vector.multi_reduction <maximumf>, %25, %cst_18 [2] : vector<2x8x8xf32> to vector<2x8xf32>
    %28 = vector.shape_cast %27 : vector<2x8xf32> to vector<2x8x1xf32>
    %29 = arith.maximumf %26, %28 : vector<2x8x1xf32>
    %30 = arith.subf %26, %29 : vector<2x8x1xf32>
    %31 = math.exp %30 : vector<2x8x1xf32>
    %32 = vector.broadcast %29 : vector<2x8x1xf32> to vector<2x8x8xf32>
    %33 = arith.subf %25, %32 : vector<2x8x8xf32>
    %34 = math.exp %33 : vector<2x8x8xf32>
    %c0_19 = arith.constant 0 : index
    %c0_20 = arith.constant 0 : index
    %c0_21 = arith.constant 0 : index
    %35 = vector.load %arg10[%c0_19, %c0_20, %c0_21] : memref<2x8x1xf32, #tpu.memory_space<vmem>>, vector<2x8x1xf32>
    %36 = arith.mulf %31, %35 : vector<2x8x1xf32>
    %cst_22 = arith.constant dense<0.000000e+00> : vector<2x8xf32>
    %37 = vector.multi_reduction <add>, %34, %cst_22 [2] : vector<2x8x8xf32> to vector<2x8xf32>
    %38 = vector.shape_cast %37 : vector<2x8xf32> to vector<2x8x1xf32>
    %39 = arith.addf %36, %38 : vector<2x8x1xf32>
    %c0_23 = arith.constant 0 : index
    %c0_24 = arith.constant 0 : index
    %c0_25 = arith.constant 0 : index
    %40 = vector.load %arg10[%c0_23, %c0_24, %c0_25] : memref<2x8x1xf32, #tpu.memory_space<vmem>>, vector<2x8x1xf32>
    tpu.vector_store %arg10[%c0_23, %c0_24, %c0_25], %39 {strides = array<i32>} : memref<2x8x1xf32, #tpu.memory_space<vmem>>, vector<2x8x1xf32>,
    %41 = arith.truncf %34 : vector<2x8x8xf32> to vector<2x8x8xbf16>
    %cst_26 = arith.constant dense<0.000000e+00> : vector<2x8x16xf32>
    %42 = tpu.matmul %41, %8, %cst_26 {dimension_numbers = #tpu.dot_dimension_numbers<[2], [1], [1], [2], [0, 0, 0, 1, 1, 2], [0], [0]>} : vector<2x8x8xbf16>, vector<2x8x16xbf16>, vector<2x8x16xf32> -> vector<2x8x16xf32>
    %c0_27 = arith.constant 0 : index
    %c0_28 = arith.constant 0 : index
    %c0_29 = arith.constant 0 : index
    %43 = vector.load %arg11[%c0_27, %c0_28, %c0_29] : memref<2x8x16xf32, #tpu.memory_space<vmem>>, vector<2x8x16xf32>
    %44 = vector.broadcast %31 : vector<2x8x1xf32> to vector<2x8x16xf32>
    %45 = arith.mulf %44, %43 : vector<2x8x16xf32>
    %46 = arith.addf %45, %42 : vector<2x8x16xf32>
    %c0_30 = arith.constant 0 : index
    %c0_31 = arith.constant 0 : index
    %c0_32 = arith.constant 0 : index
    %47 = vector.load %arg11[%c0_30, %c0_31, %c0_32] : memref<2x8x16xf32, #tpu.memory_space<vmem>>, vector<2x8x16xf32>
    tpu.vector_store %arg11[%c0_30, %c0_31, %c0_32], %46 {strides = array<i32>} : memref<2x8x16xf32, #tpu.memory_space<vmem>>, vector<2x8x16xf32>,
    %c0_33 = arith.constant 0 : index
    %c0_34 = arith.constant 0 : index
    %c0_35 = arith.constant 0 : index
    %48 = vector.load %arg9[%c0_33, %c0_34, %c0_35] : memref<2x8x1xf32, #tpu.memory_space<vmem>>, vector<2x8x1xf32>
    tpu.vector_store %arg9[%c0_33, %c0_34, %c0_35], %29 {strides = array<i32>} : memref<2x8x1xf32, #tpu.memory_space<vmem>>, vector<2x8x1xf32>,
    %c0_i32_36 = arith.constant 0 : i32
    %49 = arith.cmpi eq, %arg2, %c0_i32_36 : i32
    %50 = arith.extui %49 : i1 to i32
    %c0_i32_37 = arith.constant 0 : i32
    %51 = arith.cmpi ne, %50, %c0_i32_37 : i32
    scf.if %51 {
      %c0_38 = arith.constant 0 : index
      %c0_39 = arith.constant 0 : index
      %c0_40 = arith.constant 0 : index
      %52 = vector.load %arg11[%c0_38, %c0_39, %c0_40] : memref<2x8x16xf32, #tpu.memory_space<vmem>>, vector<2x8x16xf32>
      %c0_41 = arith.constant 0 : index
      %c0_42 = arith.constant 0 : index
      %c0_43 = arith.constant 0 : index
      %53 = vector.load %arg10[%c0_41, %c0_42, %c0_43] : memref<2x8x1xf32, #tpu.memory_space<vmem>>, vector<2x8x1xf32>
      %54 = tpu.reciprocal %53 : vector<2x8x1xf32> -> vector<2x8x1xf32>
      %55 = vector.broadcast %54 : vector<2x8x1xf32> to vector<2x8x16xf32>
      %56 = arith.mulf %52, %55 : vector<2x8x16xf32>
      %57 = arith.truncf %56 : vector<2x8x16xf32> to vector<2x8x16xbf16>
      %cst_44 = arith.constant 0.000000e+00 : f32
      %58 = vector.broadcast %cst_44 : f32 to vector<8x32xf32>
      %59 = vector.extract_strided_slice %57 {offsets = [0, 0, 0], sizes = [1, 8, 16], strides = [1, 1, 1]} : vector<2x8x16xbf16> to vector<1x8x16xbf16>
      %60 = vector.shape_cast %59 : vector<1x8x16xbf16> to vector<8x16xbf16>
      %c0_45 = arith.constant 0 : index
      %c0_46 = arith.constant 0 : index
      %c0_47 = arith.constant 0 : index
      %61 = vector.load %arg6[%c0_45, %c0_46, %c0_47] : memref<2x16x32xbf16, #tpu.memory_space<vmem>>, vector<1x16x32xbf16>
      %62 = vector.shape_cast %61 : vector<1x16x32xbf16> to vector<16x32xbf16>
      %cst_48 = arith.constant dense<0.000000e+00> : vector<8x32xf32>
      %63 = tpu.matmul %60, %62, %cst_48 {dimension_numbers = #tpu.dot_dimension_numbers<[1], [0], [0], [1], [0, 0, 1, 1], [], []>} : vector<8x16xbf16>, vector<16x32xbf16>, vector<8x32xf32> -> vector<8x32xf32>
      %64 = arith.addf %58, %63 : vector<8x32xf32>
      %65 = vector.extract_strided_slice %57 {offsets = [1, 0, 0], sizes = [1, 8, 16], strides = [1, 1, 1]} : vector<2x8x16xbf16> to vector<1x8x16xbf16>
      %66 = vector.shape_cast %65 : vector<1x8x16xbf16> to vector<8x16xbf16>
      %c1 = arith.constant 1 : index
      %c0_49 = arith.constant 0 : index
      %c0_50 = arith.constant 0 : index
      %67 = vector.load %arg6[%c1, %c0_49, %c0_50] : memref<2x16x32xbf16, #tpu.memory_space<vmem>>, vector<1x16x32xbf16>
      %68 = vector.shape_cast %67 : vector<1x16x32xbf16> to vector<16x32xbf16>
      %cst_51 = arith.constant dense<0.000000e+00> : vector<8x32xf32>
      %69 = tpu.matmul %66, %68, %cst_51 {dimension_numbers = #tpu.dot_dimension_numbers<[1], [0], [0], [1], [0, 0, 1, 1], [], []>} : vector<8x16xbf16>, vector<16x32xbf16>, vector<8x32xf32> -> vector<8x32xf32>
      %70 = arith.addf %64, %69 : vector<8x32xf32>
      %c0_52 = arith.constant 0 : index
      %c0_53 = arith.constant 0 : index
      %71 = vector.load %arg7[%c0_52, %c0_53] : memref<1x32xf32, #tpu.memory_space<vmem>>, vector<1x32xf32>
      %72 = vector.broadcast %71 : vector<1x32xf32> to vector<8x32xf32>
      %73 = arith.addf %70, %72 : vector<8x32xf32>
      %c0_54 = arith.constant 0 : index
      %c0_55 = arith.constant 0 : index
      %c0_56 = arith.constant 0 : index
      %74 = vector.load %arg8[%c0_54, %c0_55, %c0_56] : memref<1x8x32xf32, #tpu.memory_space<vmem>>, vector<1x8x32xf32>
      %75 = vector.shape_cast %74 : vector<1x8x32xf32> to vector<8x32xf32>
      %76 = vector.shape_cast %73 : vector<8x32xf32> to vector<1x8x32xf32>
      tpu.vector_store %arg8[%c0_54, %c0_55, %c0_56], %76 {strides = array<i32>} : memref<1x8x32xf32, #tpu.memory_space<vmem>>, vector<1x8x32xf32>,
    } else {
    }
    return
  }
  func.func @transform_0(%arg0: i32, %arg1: i32, %arg2: i32) -> (i32, i32, i32, i32) {
    %c0_i32 = arith.constant 0 : i32
    %c0_i32_0 = arith.constant 0 : i32
    %c0_i32_1 = arith.constant 0 : i32
    return %arg0, %c0_i32, %arg1, %c0_i32_0 : i32, i32, i32, i32
  }
  func.func @transform_1(%arg0: i32, %arg1: i32, %arg2: i32) -> (i32, i32, i32, i32) {
    %c0_i32 = arith.constant 0 : i32
    %c0_i32_0 = arith.constant 0 : i32
    %c0_i32_1 = arith.constant 0 : i32
    return %arg0, %c0_i32, %arg2, %c0_i32_0 : i32, i32, i32, i32
  }
  func.func @transform_2(%arg0: i32, %arg1: i32, %arg2: i32) -> (i32, i32, i32, i32) {
    %c0_i32 = arith.constant 0 : i32
    %c0_i32_0 = arith.constant 0 : i32
    %c0_i32_1 = arith.constant 0 : i32
    return %arg0, %c0_i32, %arg2, %c0_i32_0 : i32, i32, i32, i32
  }
  func.func @transform_3(%arg0: i32, %arg1: i32, %arg2: i32) -> (i32, i32, i32) {
    %c0_i32 = arith.constant 0 : i32
    %c0_i32_0 = arith.constant 0 : i32
    %c0_i32_1 = arith.constant 0 : i32
    %c0_i32_2 = arith.constant 0 : i32
    return %c0_i32, %c0_i32_0, %c0_i32_1 : i32, i32, i32
  }
  func.func @transform_4(%arg0: i32, %arg1: i32, %arg2: i32) -> (i32, i32) {
    %c0_i32 = arith.constant 0 : i32
    %c0_i32_0 = arith.constant 0 : i32
    %c0_i32_1 = arith.constant 0 : i32
    return %c0_i32, %c0_i32_0 : i32, i32
  }
  func.func @transform_5(%arg0: i32, %arg1: i32, %arg2: i32) -> (i32, i32, i32) {
    %c0_i32 = arith.constant 0 : i32
    %c0_i32_0 = arith.constant 0 : i32
    return %arg0, %arg1, %c0_i32 : i32, i32, i32
  }
}

module attributes {stable_mosaic.version = 11 : i64} {
  func.func @kernel(%arg0: i32, %arg1: i32, %arg2: i32, %arg3: memref<1x2x8x16xbf16, #tpu.memory_space<vmem>>, %arg4: memref<1x2x8x16xbf16, #tpu.memory_space<vmem>>, %arg5: memref<1x2x8x16xbf16, #tpu.memory_space<vmem>>, %arg6: memref<2x16x32xbf16, #tpu.memory_space<vmem>>, %arg7: memref<1x32xf32, #tpu.memory_space<vmem>>, %arg8: memref<1x8x32xf32, #tpu.memory_space<vmem>>, %arg9: memref<2x8x1xf32, #tpu.memory_space<vmem>>, %arg10: memref<2x8x1xf32, #tpu.memory_space<vmem>>, %arg11: memref<2x8x16xf32, #tpu.memory_space<vmem>>) attributes {dimension_semantics = [#tpu.dimension_semantics<parallel>, #tpu.dimension_semantics<parallel>, #tpu.dimension_semantics<arbitrary>], iteration_bounds = array<i64: 2, 1, 1>, scalar_prefetch = 0 : i64, scratch_operands = 3 : i64, tpu.core_type = #tpu.core_type<tc>, window_params = [{transform_indices = @transform_0, window_bounds = array<i64: 1, 2, 8, 16>}, {transform_indices = @transform_1, window_bounds = array<i64: 1, 2, 8, 16>}, {transform_indices = @transform_2, window_bounds = array<i64: 1, 2, 8, 16>}, {pipeline_mode = #tpu.pipeline_mode<synchronous>, transform_indices = @transform_3, window_bounds = array<i64: 2, 16, 32>}, {pipeline_mode = #tpu.pipeline_mode<synchronous>, transform_indices = @transform_4, window_bounds = array<i64: 1, 32>}, {transform_indices = @transform_5, window_bounds = array<i64: 1, 8, 32>}]} {
    %c0_i32 = arith.constant 0 : i32
    %0 = arith.cmpi eq, %arg2, %c0_i32 : i32
    %1 = arith.extui %0 : i1 to i32
    %c0_i32_0 = arith.constant 0 : i32
    %2 = arith.cmpi ne, %1, %c0_i32_0 : i32
    scf.if %2 {
      %cst_38 = arith.constant 0xFF800000 : f32
      %52 = vector.broadcast %cst_38 : f32 to vector<2x8x1xf32>
      %c0_39 = arith.constant 0 : index
      %c0_40 = arith.constant 0 : index
      %c0_41 = arith.constant 0 : index
      %53 = vector.load %arg9[%c0_39, %c0_40, %c0_41] : memref<2x8x1xf32, #tpu.memory_space<vmem>>, vector<2x8x1xf32>
      tpu.vector_store %arg9[%c0_39, %c0_40, %c0_41], %52 {strides = array<i32>} : memref<2x8x1xf32, #tpu.memory_space<vmem>>, vector<2x8x1xf32>,
      %cst_42 = arith.constant 0.000000e+00 : f32
      %54 = vector.broadcast %cst_42 : f32 to vector<2x8x1xf32>
      %c0_43 = arith.constant 0 : index
      %c0_44 = arith.constant 0 : index
      %c0_45 = arith.constant 0 : index
      %55 = vector.load %arg10[%c0_43, %c0_44, %c0_45] : memref<2x8x1xf32, #tpu.memory_space<vmem>>, vector<2x8x1xf32>
      tpu.vector_store %arg10[%c0_43, %c0_44, %c0_45], %54 {strides = array<i32>} : memref<2x8x1xf32, #tpu.memory_space<vmem>>, vector<2x8x1xf32>,
      %cst_46 = arith.constant 0.000000e+00 : f32
      %56 = vector.broadcast %cst_46 : f32 to vector<2x8x16xf32>
      %c0_47 = arith.constant 0 : index
      %c0_48 = arith.constant 0 : index
      %c0_49 = arith.constant 0 : index
      %57 = vector.load %arg11[%c0_47, %c0_48, %c0_49] : memref<2x8x16xf32, #tpu.memory_space<vmem>>, vector<2x8x16xf32>
      tpu.vector_store %arg11[%c0_47, %c0_48, %c0_49], %56 {strides = array<i32>} : memref<2x8x16xf32, #tpu.memory_space<vmem>>, vector<2x8x16xf32>,
    } else {
    }
    %c0 = arith.constant 0 : index
    %c0_1 = arith.constant 0 : index
    %c0_2 = arith.constant 0 : index
    %c0_3 = arith.constant 0 : index
    %3 = vector.load %arg3[%c0, %c0_1, %c0_2, %c0_3] : memref<1x2x8x16xbf16, #tpu.memory_space<vmem>>, vector<1x2x8x16xbf16>
    %4 = vector.shape_cast %3 : vector<1x2x8x16xbf16> to vector<2x8x16xbf16>
    %c0_4 = arith.constant 0 : index
    %c0_5 = arith.constant 0 : index
    %c0_6 = arith.constant 0 : index
    %c0_7 = arith.constant 0 : index
    %5 = vector.load %arg4[%c0_4, %c0_5, %c0_6, %c0_7] : memref<1x2x8x16xbf16, #tpu.memory_space<vmem>>, vector<1x2x8x16xbf16>
    %6 = vector.shape_cast %5 : vector<1x2x8x16xbf16> to vector<2x8x16xbf16>
    %c0_8 = arith.constant 0 : index
    %c0_9 = arith.constant 0 : index
    %c0_10 = arith.constant 0 : index
    %c0_11 = arith.constant 0 : index
    %7 = vector.load %arg5[%c0_8, %c0_9, %c0_10, %c0_11] : memref<1x2x8x16xbf16, #tpu.memory_space<vmem>>, vector<1x2x8x16xbf16>
    %8 = vector.shape_cast %7 : vector<1x2x8x16xbf16> to vector<2x8x16xbf16>
    %cst = arith.constant dense<0.000000e+00> : vector<2x8x8xf32>
    %9 = tpu.matmul %4, %6, %cst {dimension_numbers = #tpu.dot_dimension_numbers<[2], [2], [1], [1], [0, 0, 0, 1, 1, 1], [0], [0]>} : vector<2x8x16xbf16>, vector<2x8x16xbf16>, vector<2x8x8xf32> -> vector<2x8x8xf32>
    %c8_i32 = arith.constant 8 : i32
    %10 = arith.muli %arg1, %c8_i32 : i32
    %c8_i32_12 = arith.constant 8 : i32
    %11 = arith.muli %arg2, %c8_i32_12 : i32
    %12 = tpu.iota {dimensions = array<i32: 0>} : vector<8x8xi32>
    %13 = vector.broadcast %10 : i32 to vector<8x8xi32>
    %14 = arith.addi %12, %13 : vector<8x8xi32>
    %15 = tpu.iota {dimensions = array<i32: 1>} : vector<8x8xi32>
    %16 = vector.broadcast %11 : i32 to vector<8x8xi32>
    %17 = arith.addi %15, %16 : vector<8x8xi32>
    %18 = arith.cmpi sge, %14, %17 : vector<8x8xi32>
    %19 = vector.shape_cast %18 : vector<8x8xi1> to vector<1x8x8xi1>
    %cst_13 = arith.constant -1.000000e+20 : f32
    %20 = vector.shape_cast %19 : vector<1x8x8xi1> to vector<1x8x8xi1>
    %21 = vector.broadcast %20 : vector<1x8x8xi1> to vector<2x8x8xi1>
    %22 = vector.broadcast %cst_13 : f32 to vector<2x8x8xf32>
    %23 = arith.select %21, %9, %22 : vector<2x8x8xi1>, vector<2x8x8xf32>
    %cst_14 = arith.constant 0.176776692 : f32
    %24 = vector.broadcast %cst_14 : f32 to vector<2x8x8xf32>
    %25 = arith.mulf %23, %24 : vector<2x8x8xf32>
    %c0_15 = arith.constant 0 : index
    %c0_16 = arith.constant 0 : index
    %c0_17 = arith.constant 0 : index
    %26 = vector.load %arg9[%c0_15, %c0_16, %c0_17] : memref<2x8x1xf32, #tpu.memory_space<vmem>>, vector<2x8x1xf32>
    %cst_18 = arith.constant dense<0xFF800000> : vector<2x8xf32>
    %27 = vector.multi_reduction <maximumf>, %25, %cst_18 [2] : vector<2x8x8xf32> to vector<2x8xf32>
    %28 = vector.shape_cast %27 : vector<2x8xf32> to vector<2x8x1xf32>
    %29 = arith.maximumf %26, %28 : vector<2x8x1xf32>
    %30 = arith.subf %26, %29 : vector<2x8x1xf32>
    %31 = math.exp %30 : vector<2x8x1xf32>
    %32 = vector.broadcast %29 : vector<2x8x1xf32> to vector<2x8x8xf32>
    %33 = arith.subf %25, %32 : vector<2x8x8xf32>
    %34 = math.exp %33 : vector<2x8x8xf32>
    %c0_19 = arith.constant 0 : index
    %c0_20 = arith.constant 0 : index
    %c0_21 = arith.constant 0 : index
    %35 = vector.load %arg10[%c0_19, %c0_20, %c0_21] : memref<2x8x1xf32, #tpu.memory_space<vmem>>, vector<2x8x1xf32>
    %36 = arith.mulf %31, %35 : vector<2x8x1xf32>
    %cst_22 = arith.constant dense<0.000000e+00> : vector<2x8xf32>
    %37 = vector.multi_reduction <add>, %34, %cst_22 [2] : vector<2x8x8xf32> to vector<2x8xf32>
    %38 = vector.shape_cast %37 : vector<2x8xf32> to vector<2x8x1xf32>
    %39 = arith.addf %36, %38 : vector<2x8x1xf32>
    %c0_23 = arith.constant 0 : index
    %c0_24 = arith.constant 0 : index
    %c0_25 = arith.constant 0 : index
    %40 = vector.load %arg10[%c0_23, %c0_24, %c0_25] : memref<2x8x1xf32, #tpu.memory_space<vmem>>, vector<2x8x1xf32>
    tpu.vector_store %arg10[%c0_23, %c0_24, %c0_25], %39 {strides = array<i32>} : memref<2x8x1xf32, #tpu.memory_space<vmem>>, vector<2x8x1xf32>,
    %41 = arith.truncf %34 : vector<2x8x8xf32> to vector<2x8x8xbf16>
    %cst_26 = arith.constant dense<0.000000e+00> : vector<2x8x16xf32>
    %42 = tpu.matmul %41, %8, %cst_26 {dimension_numbers = #tpu.dot_dimension_numbers<[2], [1], [1], [2], [0, 0, 0, 1, 1, 2], [0], [0]>} : vector<2x8x8xbf16>, vector<2x8x16xbf16>, vector<2x8x16xf32> -> vector<2x8x16xf32>
    %c0_27 = arith.constant 0 : index
    %c0_28 = arith.constant 0 : index
    %c0_29 = arith.constant 0 : index
    %43 = vector.load %arg11[%c0_27, %c0_28, %c0_29] : memref<2x8x16xf32, #tpu.memory_space<vmem>>, vector<2x8x16xf32>
    %44 = vector.broadcast %31 : vector<2x8x1xf32> to vector<2x8x16xf32>
    %45 = arith.mulf %44, %43 : vector<2x8x16xf32>
    %46 = arith.addf %45, %42 : vector<2x8x16xf32>
    %c0_30 = arith.constant 0 : index
    %c0_31 = arith.constant 0 : index
    %c0_32 = arith.constant 0 : index
    %47 = vector.load %arg11[%c0_30, %c0_31, %c0_32] : memref<2x8x16xf32, #tpu.memory_space<vmem>>, vector<2x8x16xf32>
    tpu.vector_store %arg11[%c0_30, %c0_31, %c0_32], %46 {strides = array<i32>} : memref<2x8x16xf32, #tpu.memory_space<vmem>>, vector<2x8x16xf32>,
    %c0_33 = arith.constant 0 : index
    %c0_34 = arith.constant 0 : index
    %c0_35 = arith.constant 0 : index
    %48 = vector.load %arg9[%c0_33, %c0_34, %c0_35] : memref<2x8x1xf32, #tpu.memory_space<vmem>>, vector<2x8x1xf32>
    tpu.vector_store %arg9[%c0_33, %c0_34, %c0_35], %29 {strides = array<i32>} : memref<2x8x1xf32, #tpu.memory_space<vmem>>, vector<2x8x1xf32>,
    %c0_i32_36 = arith.constant 0 : i32
    %49 = arith.cmpi eq, %arg2, %c0_i32_36 : i32
    %50 = arith.extui %49 : i1 to i32
    %c0_i32_37 = arith.constant 0 : i32
    %51 = arith.cmpi ne, %50, %c0_i32_37 : i32
    scf.if %51 {
      %c0_38 = arith.constant 0 : index
      %c0_39 = arith.constant 0 : index
      %c0_40 = arith.constant 0 : index
      %52 = vector.load %arg11[%c0_38, %c0_39, %c0_40] : memref<2x8x16xf32, #tpu.memory_space<vmem>>, vector<2x8x16xf32>
      %c0_41 = arith.constant 0 : index
      %c0_42 = arith.constant 0 : index
      %c0_43 = arith.constant 0 : index
      %53 = vector.load %arg10[%c0_41, %c0_42, %c0_43] : memref<2x8x1xf32, #tpu.memory_space<vmem>>, vector<2x8x1xf32>
      %54 = tpu.reciprocal %53 : vector<2x8x1xf32> -> vector<2x8x1xf32>
      %55 = vector.broadcast %54 : vector<2x8x1xf32> to vector<2x8x16xf32>
      %56 = arith.mulf %52, %55 : vector<2x8x16xf32>
      %57 = arith.truncf %56 : vector<2x8x16xf32> to vector<2x8x16xbf16>
      %cst_44 = arith.constant 0.000000e+00 : f32
      %58 = vector.broadcast %cst_44 : f32 to vector<8x32xf32>
      %59 = vector.extract_strided_slice %57 {offsets = [0, 0, 0], sizes = [1, 8, 16], strides = [1, 1, 1]} : vector<2x8x16xbf16> to vector<1x8x16xbf16>
      %60 = vector.shape_cast %59 : vector<1x8x16xbf16> to vector<8x16xbf16>
      %c0_45 = arith.constant 0 : index
      %c0_46 = arith.constant 0 : index
      %c0_47 = arith.constant 0 : index
      %61 = vector.load %arg6[%c0_45, %c0_46, %c0_47] : memref<2x16x32xbf16, #tpu.memory_space<vmem>>, vector<1x16x32xbf16>
      %62 = vector.shape_cast %61 : vector<1x16x32xbf16> to vector<16x32xbf16>
      %cst_48 = arith.constant dense<0.000000e+00> : vector<8x32xf32>
      %63 = tpu.matmul %60, %62, %cst_48 {dimension_numbers = #tpu.dot_dimension_numbers<[1], [0], [0], [1], [0, 0, 1, 1], [], []>} : vector<8x16xbf16>, vector<16x32xbf16>, vector<8x32xf32> -> vector<8x32xf32>
      %64 = arith.addf %58, %63 : vector<8x32xf32>
      %65 = vector.extract_strided_slice %57 {offsets = [1, 0, 0], sizes = [1, 8, 16], strides = [1, 1, 1]} : vector<2x8x16xbf16> to vector<1x8x16xbf16>
      %66 = vector.shape_cast %65 : vector<1x8x16xbf16> to vector<8x16xbf16>
      %c1 = arith.constant 1 : index
      %c0_49 = arith.constant 0 : index
      %c0_50 = arith.constant 0 : index
      %67 = vector.load %arg6[%c1, %c0_49, %c0_50] : memref<2x16x32xbf16, #tpu.memory_space<vmem>>, vector<1x16x32xbf16>
      %68 = vector.shape_cast %67 : vector<1x16x32xbf16> to vector<16x32xbf16>
      %cst_51 = arith.constant dense<0.000000e+00> : vector<8x32xf32>
      %69 = tpu.matmul %66, %68, %cst_51 {dimension_numbers = #tpu.dot_dimension_numbers<[1], [0], [0], [1], [0, 0, 1, 1], [], []>} : vector<8x16xbf16>, vector<16x32xbf16>, vector<8x32xf32> -> vector<8x32xf32>
      %70 = arith.addf %64, %69 : vector<8x32xf32>
      %c0_52 = arith.constant 0 : index
      %c0_53 = arith.constant 0 : index
      %71 = vector.load %arg7[%c0_52, %c0_53] : memref<1x32xf32, #tpu.memory_space<vmem>>, vector<1x32xf32>
      %72 = vector.broadcast %71 : vector<1x32xf32> to vector<8x32xf32>
      %73 = arith.addf %70, %72 : vector<8x32xf32>
      %c0_54 = arith.constant 0 : index
      %c0_55 = arith.constant 0 : index
      %c0_56 = arith.constant 0 : index
      %74 = vector.load %arg8[%c0_54, %c0_55, %c0_56] : memref<1x8x32xf32, #tpu.memory_space<vmem>>, vector<1x8x32xf32>
      %75 = vector.shape_cast %74 : vector<1x8x32xf32> to vector<8x32xf32>
      %76 = vector.shape_cast %73 : vector<8x32xf32> to vector<1x8x32xf32>
      tpu.vector_store %arg8[%c0_54, %c0_55, %c0_56], %76 {strides = array<i32>} : memref<1x8x32xf32, #tpu.memory_space<vmem>>, vector<1x8x32xf32>,
    } else {
    }
    return
  }
  func.func @transform_0(%arg0: i32, %arg1: i32, %arg2: i32) -> (i32, i32, i32, i32) {
    %c0_i32 = arith.constant 0 : i32
    %c0_i32_0 = arith.constant 0 : i32
    %c0_i32_1 = arith.constant 0 : i32
    return %arg0, %c0_i32, %arg1, %c0_i32_0 : i32, i32, i32, i32
  }
  func.func @transform_1(%arg0: i32, %arg1: i32, %arg2: i32) -> (i32, i32, i32, i32) {
    %c0_i32 = arith.constant 0 : i32
    %c0_i32_0 = arith.constant 0 : i32
    %c0_i32_1 = arith.constant 0 : i32
    return %arg0, %c0_i32, %arg2, %c0_i32_0 : i32, i32, i32, i32
  }
  func.func @transform_2(%arg0: i32, %arg1: i32, %arg2: i32) -> (i32, i32, i32, i32) {
    %c0_i32 = arith.constant 0 : i32
    %c0_i32_0 = arith.constant 0 : i32
    %c0_i32_1 = arith.constant 0 : i32
    return %arg0, %c0_i32, %arg2, %c0_i32_0 : i32, i32, i32, i32
  }
  func.func @transform_3(%arg0: i32, %arg1: i32, %arg2: i32) -> (i32, i32, i32) {
    %c0_i32 = arith.constant 0 : i32
    %c0_i32_0 = arith.constant 0 : i32
    %c0_i32_1 = arith.constant 0 : i32
    %c0_i32_2 = arith.constant 0 : i32
    return %c0_i32, %c0_i32_0, %c0_i32_1 : i32, i32, i32
  }
  func.func @transform_4(%arg0: i32, %arg1: i32, %arg2: i32) -> (i32, i32) {
    %c0_i32 = arith.constant 0 : i32
    %c0_i32_0 = arith.constant 0 : i32
    %c0_i32_1 = arith.constant 0 : i32
    return %c0_i32, %c0_i32_0 : i32, i32
  }
  func.func @transform_5(%arg0: i32, %arg1: i32, %arg2: i32) -> (i32, i32, i32) {
    %c0_i32 = arith.constant 0 : i32
    %c0_i32_0 = arith.constant 0 : i32
    return %arg0, %arg1, %c0_i32 : i32, i32, i32
  }
}

</mosaic_0001>

<bundles_post_ra>
// kernel: tpu_custom_call.1
= control target key start
LH: loop header
LB: loop body
LE: loop exit
PB: predicated region body
PF: predicated region fallthrough
CT: control target
= control target key end

     0   :  { %s1760_s0 = inlined_call_operand.hbm [shape: bf16[2,2,8,16], index: 0, kind: input, shape index: {}]   ;;  %s1761_s1 = inlined_call_operand.hbm [shape: bf16[2,2,8,16], index: 1, kind: input, shape index: {}]   ;;  %s1762_s2 = inlined_call_operand.hbm [shape: bf16[2,2,8,16], index: 2, kind: input, shape index: {}]   ;;  %s1763_s3 = inlined_call_operand.hbm [shape: bf16[2,16,32], index: 3, kind: input, shape index: {}]   ;;  %s1764_s4 = inlined_call_operand.vmem [shape: f32[1,32], index: 4, kind: input, shape index: {}]   ;;  %s1765_s5 = inlined_call_operand.hbm [shape: f32[2,8,32], index: 5, kind: output, shape index: {}]  }
   0x1   :  { %1785 = sst [smem:[#allocation23_spill]] %s1760_s0 }
   0x2   :  { %1786 = sst [smem:[#allocation24_spill]] %s1761_s1 }
   0x3   :  { %10 = vsyncpa [#allocation6], 0 }
   0x4   :  { %12 = vsyncpa [#allocation6 + $0x1], 0 }
   0x5   :  { %13 = vsyncpa [#allocation9], 0 }
   0x6   :  { %15 = vsyncpa [#allocation9 + $0x1], 0 }
   0x7   :  { %16 = vsyncpa [#allocation12], 0 }
   0x8   :  { %17 = vsyncpa [#allocation7], 0 }
   0x9   :  { %19 = vsyncpa [#allocation7 + $0x1], 0  ;;  %s1389_s18 = smov 0   ;;  %s1391_s19 = smov 0  }
   0xa   :  { %s1393_s20 = smov 0   ;;  %s1395_s21 = smov 0  }
   0xb   :  { %s1397_s22 = smov 0   ;;  %s1399_s23 = smov 0  }
   0xc LB: > { %1787 = sst [smem:[#allocation18_spill]] %s1334_s20  ;;  %s44_s24 = sadd.s32 1, %s1342_s22  ;;  %s1346_s23 = sphi %s1399_s23, %s25_s23   ;;  %s1342_s22 = sphi %s1397_s22, %s1819_s22   ;;  %s1338_s21 = sphi %s1395_s21, %s1818_s21   ;;  %s1334_s20 = sphi %s1393_s20, %s1817_s20   ;;  %s1330_s19 = sphi %s1391_s19, %s1821_s19   ;;  %s1326_s18 = sphi %s1389_s18, %s1820_s18  }
   0xd   : > { %1788 = sst [smem:[#allocation19_spill]] %s1342_s22  ;;  %s53_s25 = sadd.s32 1, %s1334_s20 }
   0xe   : > { %1789 = sst [smem:[#allocation20_spill]] %s1346_s23  ;;  %p46_p0 = scmp.ge.s32.totalorder %s44_s24, 2 }
   0xf   : > { %p1766_p1 = scmp.ne.s32.totalorder %s1334_s20, %s1330_s19  ;;  %p61_p2 = scmp.eq.s32.totalorder %s1346_s23, 0 }
  0x10   : > { %s1823_s24 = smov (%p46_p0, %s44_s24), 0  ;;  %p1064_p6 = scmp.lt.s32.totalorder %s1346_s23, 2 }
  0x11   : > { %1790 = sst [smem:[#allocation21_spill]] %s1823_s24  ;;  %p62_p3 = por %p61_p2, %p1766_p1 }
  0x12   : > { %s48_s26 = ssub.s32 %s1342_s22, %s1823_s24  ;;  %s1771_s27 = sand.u32 1, %s1334_s20  }
  0x13   : > { %p51_p5 = scmp.eq.s32.totalorder %s48_s26, 0  ;;  %s1435_s28 = sshll.u32 %s1342_s22, 7 }
  0x14   : > { %s1442_s30 = sshll.u32 %s1771_s27, 3  ;;  %p1444_p7 = pnand %p1064_p6, %p62_p3 }
  0x15   : > { %s1438_s29 = scalar_select %p51_p5, %s1334_s20, %s53_s25  }
  0x16   : > { %s1792_s6 = scalar_select %p1444_p7, 1, 0 }
  0x17   : > { %1791 = sst [smem:[#allocation22_spill]] %s1438_s29  ;;  %s254_s7 = sand.u32 1, %s1346_s23  }
  0x18   : > { %s1793_s1 = sld [smem:[#allocation24_spill]]  ;;  %s258_s11 = scalar_lea.vmem [#allocation8], %s1442_s30 }
  0x19   : > { %s266_s12 = sshll.u32 %s258_s11, 4  ;;  %s1458_s13 = scalar_lea.sflag [#allocation9], %s254_s7  ;;  %s1456_s12 = int_to_ptr.vmem [resolvable:$true] %s266_s12 }
  0x1a   : > { %p1464_p9 = pneg %p1444_p7 }
  0x1c   : > { %s1794_s15 = scalar_select %p1464_p9, 1, 0 }
  0x1e   : > { %s1453_s10 = scalar_lea.hbm %s1793_s1, %s1435_s28  ;;  %s1143_s25 = scalar_lea.hbm %s1793_s1, 256 }
  0x1f   : > { %s1138_s14 = scalar_lea.hbm %s1453_s10, 128  ;;  %p1144_p12 = scmp.lt.u32.totalorder %s1453_s10, %s1793_s1 }
  0x20   : > { %p1139_p8 = scmp.ne.s32.totalorder %s1453_s10, %s1138_s14  ;;  %p1145_p13 = scmp.lt.u32.totalorder %s1143_s25, %s1138_s14 }
  0x21   : > { %p1147_p2 = scmp.lt.u32.totalorder %s1138_s14, %s1453_s10 }
  0x22   : > { %p1141_p10 = pnand %p1464_p9, %p1139_p8  ;;  %p1146_p0 = por %p1145_p13, %p1144_p12 }
  0x24   : > { %p1142_p11 = pneg %p1141_p10  ;;  %p1148_p3 = por %p1147_p2, %p1146_p0 }
  0x26   : > { %p1149_p5 = pnand %p1148_p3, %p1142_p11 }
  0x28   : > { %1152 = shalt.err (!%p1149_p5)
}
  0x29   : > { %s1153_s7 = scalar_lea.vmem %s1456_s12, 128  ;;  %s1348_s9 = smov [#allocation8]  }
  0x2a   : > { %p1154_p6 = scmp.ne.s32.totalorder %s1456_s12, %s1153_s7  ;;  %s1158_s11 = sshll.u32 %s1348_s9, 4  ;;  %s1159_s11 = int_to_ptr.vmem [resolvable:$false] %s1158_s11 }
  0x2b   : > { %s1160_s16 = scalar_lea.vmem %s1159_s11, 256  ;;  %p1161_p4 = scmp.lt.s32.totalorder %s1456_s12, %s1159_s11 }
  0x2c   : > { %p1156_p8 = pnand %p1154_p6, %p1464_p9  ;;  %p1162_p1 = scmp.lt.s32.totalorder %s1160_s16, %s1153_s7 }
  0x2e   : > { %p1157_p10 = pneg %p1156_p8  ;;  %p1163_p12 = por %p1162_p1, %p1161_p4 }
  0x30   : > { %p1164_p13 = pnand %p1163_p12, %p1157_p10 }
  0x32   : > { %1167 = shalt.err (!%p1164_p13)
}
  0x33   : > { %s1767_s14 = smov 64   ;;  %s1769_s17 = smov 4  }
  0x34   : > { %1055 = dma.hbm_to_vmem [thread:$0]  (!%p1444_p7), %s1453_s10, 128, %s1456_s12, %s1458_s13, %s1767_s14, %s1767_s14, %s1769_s17  }
  0x35   : > { %s1492_s25 = sadd.s32 4294967295, %s1346_s23   ;;  %s950_s26 = sadd.s32 4294967294, %s1346_s23  }
  0x36   : > { %p66_p1 = scmp.ne.s32.totalorder %s1330_s19, %s1326_s18  ;;  %p1776_p4 = scmp.eq.s32.totalorder %s1492_s25, 0 }
  0x37   : > { %p190_p11 = scmp.eq.s32.totalorder %s1492_s25, 1  ;;  %p196_p0 = scmp.eq.s32.totalorder %s950_s26, 1 }
  0x38   : > { %p951_p2 = scmp.ge.s32.totalorder %s1346_s23, 1  ;;  %p1502_p3 = por %p1776_p4, %p66_p1 }
  0x39   : > { %p1796_p5 = scmp.ne.s32.totalorder %s1334_s20, %s1330_s19  ;;  %p1513_p8 = por %p196_p0, %p66_p1 }
  0x3a   : > { %s1795_s8 = scalar_select %p1502_p3, 1, 0 }
  0x3b   : > { %p1509_p6 = por %p190_p11, %p1796_p5  ;;  %p203_p10 = scmp.lt.s32.totalorder %s1346_s23, 3 }
  0x3c   : > { %s1798_s12 = scalar_select %p1513_p8, 1, 0 }
  0x3d   : > { %s1797_s10 = scalar_select %p1509_p6, 1, 0 }
  0x3e   : > { %p1518_p12 = pnand %p951_p2, %p203_p10  ;;  %s1351_s9 = smov [#allocation11]  }
  0x3f   : > { %s215_s11 = sshll.u32 %s1351_s9, 4  ;;  %s1800_s0 = sld [smem:[#allocation23_spill]]  ;;  %s1522_s11 = int_to_ptr.vmem [resolvable:$true] %s215_s11 }
  0x40   : > { %s1799_s7 = scalar_select %p1518_p12, 1, 0 }
  0x41   : > { %p1045_p13 = pneg %p1518_p12  ;;  %s236_s17 = scalar_lea.vmem [#allocation5], %s1442_s30 }
  0x42   : > { %s244_s27 = sshll.u32 %s236_s17, 4  ;;  %s1802_s9 = sand.u32 1, %s1334_s20   ;;  %s1539_s27 = int_to_ptr.vmem [resolvable:$true] %s244_s27 }
  0x43   : > { %p1535_p1 = pnand %p1045_p13, %p1776_p4  ;;  %s1543_s24 = scalar_lea.sflag [#allocation6], %s1802_s9 }
  0x45   : > { %s1530_s14 = scalar_lea.hbm %s1800_s0, %s1435_s28  ;;  %s1173_s29 = scalar_lea.hbm %s1800_s0, 256 }
  0x46   : > { %s1801_s1 = scalar_select %p1535_p1, 1, 0 }
  0x47   : > { %s1168_s22 = scalar_lea.hbm %s1530_s14, 128  ;;  %p1174_p5 = scmp.lt.u32.totalorder %s1530_s14, %s1800_s0 }
  0x48   : > { %p1169_p11 = scmp.ne.s32.totalorder %s1530_s14, %s1168_s22  ;;  %p1175_p10 = scmp.lt.u32.totalorder %s1173_s29, %s1168_s22 }
  0x49   : > { %p1177_p4 = scmp.lt.u32.totalorder %s1168_s22, %s1530_s14 }
  0x4a   : > { %p1171_p0 = pnand %p1169_p11, %p1464_p9  ;;  %p1176_p13 = por %p1175_p10, %p1174_p5 }
  0x4c   : > { %p1172_p2 = pneg %p1171_p0  ;;  %p1178_p8 = por %p1177_p4, %p1176_p13 }
  0x4e   : > { %p1179_p6 = pnand %p1178_p8, %p1172_p2 }
  0x50   : > { %1182 = shalt.err (!%p1179_p6)
}
  0x51   : > { %s1183_s9 = scalar_lea.vmem %s1539_s27, 128  ;;  %s1352_s16 = smov [#allocation5]  }
  0x52   : > { %p1184_p11 = scmp.ne.s32.totalorder %s1539_s27, %s1183_s9  ;;  %s1188_s26 = sshll.u32 %s1352_s16, 4  ;;  %s1189_s26 = int_to_ptr.vmem [resolvable:$false] %s1188_s26 }
  0x53   : > { %s1190_s23 = scalar_lea.vmem %s1189_s26, 256  ;;  %p1191_p12 = scmp.lt.s32.totalorder %s1539_s27, %s1189_s26 }
  0x54   : > { %p1186_p0 = pnand %p1184_p11, %p1464_p9  ;;  %p1192_p1 = scmp.lt.s32.totalorder %s1190_s23, %s1183_s9 }
  0x56   : > { %p1187_p3 = pneg %p1186_p0  ;;  %p1193_p5 = por %p1192_p1, %p1191_p12 }
  0x58   : > { %p1194_p10 = pnand %p1193_p5, %p1187_p3 }
  0x5a   : > { %1197 = shalt.err (!%p1194_p10)
}
  0x5b   : > { %s1803_s22 = smov 4   ;;  %s1804_s29 = smov 64  }
  0x5c   : > { %1052 = dma.hbm_to_vmem [thread:$0]  (!%p1444_p7), %s1530_s14, 128, %s1539_s27, %s1543_s24, %s1804_s29, %s1804_s29, %s1803_s22  }
  0x5d   : > { %s1198_s16 = scalar_lea.hbm %s1763_s3, 256  ;;  %p1805_p3 = scmp.ne.s32.totalorder %s1801_s1, 0 }
  0x5e   : > { %p1199_p4 = scmp.ne.s32.totalorder %s1763_s3, %s1198_s16  ;;  %p1205_p1 = scmp.lt.u32.totalorder %s1198_s16, %s1763_s3 }
  0x5f   : > { %p1200_p6 = pneg %p1805_p3 }
  0x61   : > { %p1201_p8 = pnand %p1200_p6, %p1199_p4 }
  0x63   : > { %p1202_p12 = pneg %p1201_p8 }
  0x65   : > { %p1207_p2 = pnand %p1205_p1, %p1202_p12 }
  0x67   : > { %1210 = shalt.err (!%p1207_p2)
}
  0x68   : > { %s1211_s24 = scalar_lea.vmem %s1522_s11, 256  ;;  %p1219_p5 = scmp.lt.s32.totalorder %s1522_s11, %s1522_s11 }
  0x69   : > { %p1212_p13 = scmp.ne.s32.totalorder %s1522_s11, %s1211_s24  ;;  %p1220_p10 = scmp.lt.s32.totalorder %s1211_s24, %s1211_s24 }
  0x6b   : > { %p1214_p11 = pnand %p1212_p13, %p1200_p6  ;;  %p1221_p7 = por %p1220_p10, %p1219_p5 }
  0x6d   : > { %p1215_p0 = pneg %p1214_p11 }
  0x6f   : > { %p1222_p9 = pnand %p1221_p7, %p1215_p0 }
  0x71   : > { %1225 = shalt.err (!%p1222_p9)
}
  0x72   : > { %1048 = dma.hbm_to_vmem [thread:$0]  (!%p1805_p3), %s1763_s3, 256, %s1522_s11, [#allocation12], %s1804_s29, %s1804_s29, %s1803_s22  }
  0x73   : > { %s1598_s17 = scalar_lea.hbm %s1762_s2, %s1435_s28  ;;  %s280_s1 = scalar_lea.vmem [#allocation10], %s1442_s30 }
  0x74   : > { %s288_s16 = sshll.u32 %s280_s1, 4  ;;  %s1226_s26 = scalar_lea.hbm %s1598_s17, 128  ;;  %s1601_s16 = int_to_ptr.vmem [resolvable:$true] %s288_s16 }
  0x75   : > { %p1227_p7 = scmp.ne.s32.totalorder %s1598_s17, %s1226_s26  ;;  %p1806_p9 = scmp.ne.s32.totalorder %s1794_s15, 0 }
  0x76   : > { %s1231_s23 = scalar_lea.hbm %s1762_s2, 256  ;;  %p1232_p3 = scmp.lt.u32.totalorder %s1598_s17, %s1762_s2 }
  0x77   : > { %p1229_p4 = pnand %p1227_p7, %p1806_p9  ;;  %p1233_p8 = scmp.lt.u32.totalorder %s1231_s23, %s1226_s26 }
  0x78   : > { %p1235_p1 = scmp.lt.u32.totalorder %s1226_s26, %s1598_s17 }
  0x79   : > { %p1230_p6 = pneg %p1229_p4  ;;  %p1234_p12 = por %p1233_p8, %p1232_p3 }
  0x7b   : > { %p1236_p2 = por %p1235_p1, %p1234_p12 }
  0x7d   : > { %p1237_p13 = pnand %p1236_p2, %p1230_p6 }
  0x7f   : > { %1240 = shalt.err (!%p1237_p13)
}
  0x80   : > { %s1241_s30 = scalar_lea.vmem %s1601_s16, 128  ;;  %s1353_s0 = smov [#allocation10]  }
  0x81   : > { %p1242_p11 = scmp.ne.s32.totalorder %s1601_s16, %s1241_s30  ;;  %s1246_s20 = sshll.u32 %s1353_s0, 4  ;;  %s1247_s20 = int_to_ptr.vmem [resolvable:$false] %s1246_s20 }
  0x82   : > { %s1248_s27 = scalar_lea.vmem %s1247_s20, 256  ;;  %p1249_p10 = scmp.lt.s32.totalorder %s1601_s16, %s1247_s20 }
  0x83   : > { %p1244_p0 = pnand %p1242_p11, %p1806_p9  ;;  %p1250_p7 = scmp.lt.s32.totalorder %s1248_s27, %s1241_s30 }
  0x85   : > { %p1245_p5 = pneg %p1244_p0  ;;  %p1251_p4 = por %p1250_p7, %p1249_p10 }
  0x87   : > { %p1252_p3 = pnand %p1251_p4, %p1245_p5 }
  0x89   : > { %1255 = shalt.err (!%p1252_p3)
}
  0x8a   : > { %p1807_p6 = scmp.ne.s32.totalorder %s1792_s6, 0  ;;  %p1808_p9 = scmp.ne.s32.totalorder %s1799_s7, 0 }
  0x8b   : > { %s1631_s15 = sand.u32 (!%p1808_p9), 1, %s1330_s19   ;;  %p1809_p8 = scmp.ne.s32.totalorder (!%p1808_p9), %s1795_s8, 0 }
  0x8c   : > { %1058 = dma.hbm_to_vmem [thread:$0]  (!%p1807_p6), %s1598_s17, 128, %s1601_s16, %s1458_s13, %s1804_s29, %s1804_s29, %s1803_s22  }
  0x8d   : > { %300 = sbr.rel (%p1808_p9) target bundleno = 1198 (0x4ae), region = 40  ;;  %s1634_s14 = sshll.u32 (!%p1808_p9), %s1631_s15, 3 }
  0x8e   : > { %s303_s6 = scalar_lea.sflag (!%p1808_p9), [#allocation6], %s1631_s15  ;;  %s306_s1 = scalar_lea.vmem (!%p1808_p9), [#allocation5], %s1634_s14 }
  0x94   : > { %1309 = dma.done.wait (%p1809_p8), %s303_s6, 128  }
  0x95   : > { %1311 = vsyncadd (%p1809_p8), %s303_s6, 4294967168  ;;  %s311_s13 = sand.u32 1, %s1492_s25   ;;  %s315_s22 = scalar_lea.vmem [#allocation8], %s1634_s14 }
  0x96   : > { %s312_s7 = scalar_lea.sflag [#allocation9], %s311_s13 }
  0x97   : > { %1313 = dma.done.wait (%p1809_p8), %s312_s7, 256  }
  0x98   : > { %1315 = vsyncadd (%p1809_p8), %s312_s7, 4294967040  ;;  %s324_s29 = scalar_lea.vmem [#allocation10], %s1634_s14  ;;  %p1810_p12 = scmp.eq.s32.totalorder %s1492_s25, 0 }
  0x9a   : > { %1317 = dma.done.wait (%p1810_p12), [#allocation12], 256   ;;  %p1811_p1 = pmov %p1810_p12 }
  0x9b   : > { %vm375_vm0 = vcmask 130048   ;;  %v1354_v0 = vmov 0.0   ;;  %vm1355_vm1 = vmmov 0   ;;  %v380_v1 = vld [vmem:[%s315_s22] sm:$0xf]  ;;  %vm370_vm2 = vcmask 7168  }
  0x9c   : > { %1319 = vsyncadd (%p1811_p1), [#allocation12], 4294967040  ;;  %997 = vmatprep.subr.bf16.mxu0 %v1354_v0  ;;  %376 = vst.msk [vmem:[#allocation4] sm:$0xff] %vm375_vm0, %v1354_v0  ;;  %1003 = vmatprep.subr.bf16.mxu1 %v1354_v0  ;;  %v381_v2 = vld [vmem:[%s315_s22 + $0x4] sm:$0xf]  ;;  %v389_v3 = vsel %vm375_vm0, %v380_v1, 0  ;;  %v479_v8 = vlaneseq }
  0x9d   : > { %377 = vst.msk [vmem:[#allocation4 + $0x8] sm:$0xff] %vm375_vm0, %v1354_v0  ;;  %999 = vmatprep.mubr.msk.bf16.mxu0 %vm1355_vm1, %v1354_v0  ;;  %1005 = vmatprep.mubr.msk.bf16.mxu1 %vm1355_vm1, %v1354_v0  ;;  %v435_v4 = vsel %vm375_vm0, %v381_v2, 0  ;;  %v378_v5 = vld [vmem:[%s306_s1] sm:$0xf]  ;;  %v379_v6 = vld [vmem:[%s306_s1 + $0x4] sm:$0xf] }
  0x9e   : > { %998 = vmatpush3.bf16.xpose.msra.mxu0 %v389_v3  ;;  %1004 = vmatpush3.bf16.xpose.msra.mxu1 %v435_v4  ;;  %v1356_v7 = vmov -inf   ;;  %373 = vst.msk [vmem:[#allocation3] sm:$0xff] %vm370_vm2, %v1354_v0  ;;  %374 = vst.msk [vmem:[#allocation3 + $0x8] sm:$0xff] %vm370_vm2, %v1354_v0  ;;  %v480_v9 = vshrl.u32 %v479_v8, 7  ;;  %v484_v10 = vand.u32 127, %v479_v8  ;;  %vm496_vm4 = vcmask 64512  }
  0x9f   : > { %1009 = vmatprep.subr.bf16.mxu0 %v1354_v0  ;;  %1015 = vmatprep.subr.bf16.mxu1 %v1354_v0  ;;  %371 = vst.msk [vmem:[#allocation2] sm:$0xff] %vm370_vm2, %v1356_v7  ;;  %372 = vst.msk [vmem:[#allocation2 + $0x8] sm:$0xff] %vm370_vm2, %v1356_v7  ;;  %v1357_v25 = vmov 0   ;;  %v382_v34 = vld [vmem:[%s324_s29] sm:$0xf]  ;;  %vm547_vm5 = vcmask 1043456  }
  0xa0   : > { %vm487_vm3 = vcmp.ge.s32.totalorder %v480_v9, %v484_v10  ;;  %1122 = vset.pattern.permute.xlu1 %v1357_v25  ;;  %1123 = vset.pattern.permute.xlu0 %v1357_v25  ;;  %v549_v35 = vsel %vm547_vm5, %v382_v34, 0  ;;  %v383_v36 = vld [vmem:[%s324_s29 + $0x4] sm:$0xf]  ;;  %v1125_v1 = vld [vmem:[#allocation11] sm:$0xff]   ;;  %v1124_v2 = vld [vmem:[#allocation11 + $0x8] sm:$0xff]   ;;  %s979_s17 = sshll.u32 %s1338_s21, 7 }
  0xa1   : > { %v595_v37 = vsel %vm547_vm5, %v383_v36, 0  ;;  %s364_s16 = scalar_lea.vmem [#allocation13], %s1634_s14  ;;  %vm791_vm6 = vcmask 261120   ;;  %s1711_s23 = scalar_lea.hbm %s1765_s5, %s979_s17 }
  0xa2   : > { %s808_s26 = sshll.u32 %s364_s16, 4  ;;  %s794_s21 = scalar_lea.sflag [#allocation7], %s1631_s15  ;;  %s1713_s26 = int_to_ptr.vmem [resolvable:$true] %s808_s26 }
  0xa3   : > { %v637_v4 = vld [vmem:[#allocation4] sm:$0xff]  ;;  %s1256_s24 = scalar_lea.vmem %s1713_s26, 128  ;;  %p1812_p13 = scmp.ne.s32.totalorder %s1797_s10, 0 }
  0xa4   : > { %v638_v7 = vld [vmem:[#allocation4 + $0x8] sm:$0xff]  ;;  %p1257_p2 = scmp.ne.s32.totalorder %s1713_s26, %s1256_s24  ;;  %s1358_s28 = smov [#allocation13]  }
  0xa5   : > { %1000 = vmatmul.mubr.msk.bf16.vlgmr.msra.gmra.mrb[0].mxu0 %vm375_vm0, %v378_v5  ;;  %1006 = vmatmul.mubr.msk.bf16.vlgmr.msra.gmra.mrb[0].mxu1 %vm375_vm0, %v379_v6  ;;  %v527_v54 = vld [vmem:[#allocation3] sm:$0xff]  ;;  %v528_v57 = vld [vmem:[#allocation3 + $0x8] sm:$0xff]  ;;  %s1260_s30 = sshll.u32 %s1358_s28, 4  ;;  %s1261_s30 = int_to_ptr.vmem [resolvable:$false] %s1260_s30 }
  0xa6   : > { %1011 = vmatprep.mubr.msk.bf16.mxu0 %vm1355_vm1, %v1354_v0  ;;  %1017 = vmatprep.mubr.msk.bf16.mxu1 %vm1355_vm1, %v1354_v0  ;;  %v494_v26 = vld [vmem:[#allocation2] sm:$0xff]  ;;  %v495_v29 = vld [vmem:[#allocation2 + $0x8] sm:$0xff]  ;;  %p1258_p11 = pnand %p1257_p2, %p1812_p13  ;;  %s1262_s0 = scalar_lea.vmem %s1261_s30, 256 }
  0xa7   : > { %1010 = vmatpush3.bf16.msra.mxu0 %v549_v35  ;;  %1016 = vmatpush3.bf16.msra.mxu1 %v595_v37  ;;  %p1263_p5 = scmp.lt.s32.totalorder %s1713_s26, %s1261_s30  ;;  %p1264_p10 = scmp.lt.s32.totalorder %s1262_s0, %s1256_s24 }
  0xa8   : > { %1021 = vmatprep.subr.bf16.mxu0 %v1354_v0  ;;  %1027 = vmatprep.subr.bf16.mxu1 %v1354_v0  ;;  %p1259_p0 = pneg %p1258_p11 }
  0xa9   : > { %p1265_p7 = por %p1264_p10, %p1263_p5 }
  0xab   : > { %p1266_p4 = pnand %p1265_p7, %p1259_p0 }
 0x178   : > { %v425_v11 = vpop.f32.mrb[0].mxu0  ;;  %v471_v12 = vpop.f32.mrb[0].mxu1 }
 0x179   : > { %v490_v13 = vsel %vm487_vm3, %v425_v11, -1e+20  ;;  %v1001_v14 = vpop.f32.mrb[1].mxu0  ;;  %v491_v15 = vsel %vm487_vm3, %v471_v12, -1e+20  ;;  %v1007_v16 = vpop.f32.mrb[1].mxu1 }
 0x17a   : > { %v492_v17 = vmul.f32 0.17677669, %v490_v13  ;;  %v493_v18 = vmul.f32 0.17677669, %v491_v15  ;;  %v428_v19 = vpop.f32.mrb[2].mxu0  ;;  %v474_v20 = vpop.f32.mrb[2].mxu1 }
 0x17b   : > { %v1002_v21 = vpop.f32.mrb[3].mxu0  ;;  %v1008_v22 = vpop.f32.mrb[3].mxu1 }
 0x17c   : > { %v497_v23 = vsel %vm496_vm4, %v492_v17, -inf  ;;  %v500_v24 = vsel %vm496_vm4, %v493_v18, -inf }
 0x17d   : > { %498 = vmax.xlane.f32.xlu0 %v497_v23 }
 0x181   : > { %501 = vmax.xlane.f32.xlu0 %v500_v24 }
 0x20a   : > { %v499_v27 = vpop.xlane.xlu0 %498 }
 0x20b   : > { %v503_v28 = vmax.f32 %v494_v26, %v499_v27 }
 0x20d   : > { %v505_v30 = vsub.f32 %v494_v26, %v503_v28  ;;  %655 = vst.msk [vmem:[#allocation2] sm:$0xff] %vm370_vm2, %v503_v28  ;;  %513 = vperm.xlu1 %1122, %v503_v28  }
 0x20e   : > { %v502_v31 = vpop.xlane.xlu0 %501 }
 0x20f   : > { %v504_v32 = vmax.f32 %v495_v29, %v502_v31  ;;  %v507_v51 = vmul.f32 1.442695, %v505_v30 }
 0x211   : > { %v506_v33 = vsub.f32 %v495_v29, %v504_v32  ;;  %656 = vst.msk [vmem:[#allocation2 + $0x8] sm:$0xff] %vm370_vm2, %v504_v32  ;;  %518 = vperm.xlu1 %1122, %v504_v32  }
 0x213   : > { %v509_v50 = vmul.f32 1.442695, %v506_v33  ;;  %v977_v33 = vld [vmem:[%s1764_s4] ss:$0 sm:$0xff] }
 0x28c   : > { %v514_v38 = vpop.permute.xlu1 %513 }
 0x28d   : > { %v521_v39 = vsub.f32 %v492_v17, %v514_v38 }
 0x28f   : > { %v523_v40 = vmul.f32 1.442695, %v521_v39 }
 0x290   : > { %v519_v41 = vpop.permute.xlu1 %518 }
 0x291   : > { %1126 = vpow2.f32 %v523_v40  ;;  %v522_v42 = vsub.f32 %v493_v18, %v519_v41 }
 0x293   : > { %v525_v43 = vmul.f32 1.442695, %v522_v42 }
 0x295   : > { %1128 = vpow2.f32 %v525_v43 }
 0x296   : > { %1130 = vpow2.f32 %v509_v50 }
 0x297   : > { %1132 = vpow2.f32 %v507_v51 }
 0x29b   : > { %v1127_v44 = vpop.eup %1126 }
 0x29c   : > { %v531_v45 = vsel %vm496_vm4, %v1127_v44, 0.0  ;;  %v542_v46 = vpack.c.bf16 %v1127_v44, %v1127_v44 }
 0x29d   : > { %532 = vadd.xlane.f32.xlu0 %v531_v45 }
 0x29e   : > { %1012 = vmatmul.mubr.msk.bf16.vlgmr.msra.gmra.mrb[4].mxu0 %vm496_vm4, %v542_v46 }
 0x29f   : > { %v1129_v47 = vpop.eup %1128  ;;  %1023 = vmatprep.mubr.msk.bf16.mxu0 %vm1355_vm1, %v1354_v0  ;;  %1022 = vmatpush3.bf16.msra.mxu0 %v1124_v2 }
 0x2a0   : > { %v534_v48 = vsel %vm496_vm4, %v1129_v47, 0.0  ;;  %v543_v49 = vpack.c.bf16 %v1129_v47, %v1129_v47  ;;  %v1131_v52 = vpop.eup %1130 }
 0x2a1   : > { %535 = vadd.xlane.f32.xlu1 %v534_v48  ;;  %v1133_v53 = vpop.eup %1132  ;;  %v530_v59 = vmul.f32 %v1131_v52, %v528_v57 }
 0x2a2   : > { %1018 = vmatmul.mubr.msk.bf16.vlgmr.msra.gmra.mrb[4].mxu1 %vm496_vm4, %v543_v49  ;;  %v529_v55 = vmul.f32 %v1133_v53, %v527_v54 }
 0x2a3   : > { %1029 = vmatprep.mubr.msk.bf16.mxu1 %vm1355_vm1, %v1354_v0  ;;  %1028 = vmatpush3.bf16.msra.mxu1 %v1125_v1 }
 0x2b2   : > { %646 = vperm.xlu1 %1122, %v1131_v52  }
 0x2b3   : > { %641 = vperm.xlu0 %1123, %v1133_v53  }
 0x32a   : > { %v533_v56 = vpop.xlane.xlu0 %532 }
 0x32b   : > { %v537_v58 = vadd.f32 %v533_v56, %v529_v55 }
 0x32d   : > { %540 = vst.msk [vmem:[#allocation3] sm:$0xff] %vm370_vm2, %v537_v58 }
 0x32e   : > { %v536_v60 = vpop.xlane.xlu1 %535 }
 0x32f   : > { %v538_v61 = vadd.f32 %v536_v60, %v530_v59 }
 0x331   : > { %541 = vst.msk [vmem:[#allocation3 + $0x8] sm:$0xff] %vm370_vm2, %v538_v61 }
 0x332   : > { %v642_v5 = vpop.permute.xlu0 %641  ;;  %v647_v8 = vpop.permute.xlu1 %646 }
 0x333   : > { %v649_v6 = vmul.f32 %v642_v5, %v637_v4  ;;  %v650_v13 = vmul.f32 %v647_v8, %v638_v7 }
 0x334   : > { %v662_v62 = vld [vmem:[#allocation3] sm:$0xff] }
 0x335   : > { %1134 = vrcp.f32 %v662_v62 }
 0x338   : > { %v663_v63 = vld [vmem:[#allocation3 + $0x8] sm:$0xff] }
 0x339   : > { %1136 = vrcp.f32 %v663_v63 }
 0x33f   : > { %v1135_v0 = vpop.eup %1134 }
 0x340   : > { %668 = vperm.xlu0 %1123, %v1135_v0  }
 0x343   : > { %v1137_v3 = vpop.eup %1136 }
 0x344   : > { %673 = vperm.xlu0 %1123, %v1137_v3  }
 0x371   : > { %v585_v9 = vpop.f32.mrb[4].mxu0 }
 0x372   : > { %v651_v10 = vadd.f32 %v649_v6, %v585_v9  ;;  %v1013_v11 = vpop.f32.mrb[5].mxu0 }
 0x373   : > { %v588_v12 = vpop.f32.mrb[6].mxu0 }
 0x374   : > { %653 = vst.msk [vmem:[#allocation4] sm:$0xff] %vm375_vm0, %v651_v10  ;;  %v1014_v14 = vpop.f32.mrb[7].mxu0 }
 0x375   : > { %v631_v15 = vpop.f32.mrb[4].mxu1 }
 0x376   : > { %v652_v16 = vadd.f32 %v650_v13, %v631_v15  ;;  %v1019_v17 = vpop.f32.mrb[5].mxu1 }
 0x377   : > { %v634_v18 = vpop.f32.mrb[6].mxu1 }
 0x378   : > { %654 = vst.msk [vmem:[#allocation4 + $0x8] sm:$0xff] %vm375_vm0, %v652_v16  ;;  %v1020_v19 = vpop.f32.mrb[7].mxu1 }
 0x37b   : > { %v660_v20 = vld [vmem:[#allocation4] sm:$0xff] }
 0x37f   : > { %v661_v24 = vld [vmem:[#allocation4 + $0x8] sm:$0xff] }
 0x3bf   : > { %v669_v21 = vpop.permute.xlu0 %668 }
 0x3c0   : > { %v676_v22 = vmul.f32 %v669_v21, %v660_v20 }
 0x3c2   : > { %v678_v23 = vpack.c.bf16 %v676_v22, %v676_v22 }
 0x3c3   : > { %v674_v25 = vpop.permute.xlu0 %673 }
 0x3c4   : > { %v677_v26 = vmul.f32 %v674_v25, %v661_v24  ;;  %1030 = vmatmul.mubr.msk.bf16.vlgmr.msra.gmra.mrb[8].mxu1 %vm375_vm0, %v678_v23 }
 0x3c6   : > { %v679_v27 = vpack.c.bf16 %v677_v26, %v677_v26 }
 0x3c8   : > { %1024 = vmatmul.mubr.msk.bf16.vlgmr.msra.gmra.mrb[8].mxu0 %vm375_vm0, %v679_v27 }
 0x497   : > { %v777_v28 = vpop.f32.mrb[8].mxu1 }
 0x498   : > { %v1031_v29 = vpop.f32.mrb[9].mxu1 }
 0x499   : > { %v780_v30 = vpop.f32.mrb[10].mxu1 }
 0x49a   : > { %v1032_v31 = vpop.f32.mrb[11].mxu1 }
 0x49b   : > { %v728_v32 = vpop.f32.mrb[8].mxu0 }
 0x49c   : > { %v778_v34 = vadd.f32 %v777_v28, %v728_v32  ;;  %v1025_v35 = vpop.f32.mrb[9].mxu0 }
 0x49d   : > { %v731_v36 = vpop.f32.mrb[10].mxu0 }
 0x49e   : > { %v790_v37 = vadd.f32 %v977_v33, %v778_v34  ;;  %v1026_v38 = vpop.f32.mrb[11].mxu0 }
 0x4a0   : > { %792 = vst.msk [vmem:[%s364_s16] sm:$0xff] %vm791_vm6, %v790_v37 }
 0x4a1   : > { %1269 = shalt.err (!%p1266_p4)
}
 0x4a2   : > { %s1270_s20 = scalar_lea.hbm %s1711_s23, 128  ;;  %s1274_s14 = scalar_lea.hbm %s1765_s5, 256 }
 0x4a3   : > { %p1271_p3 = scmp.ne.s32.totalorder %s1711_s23, %s1270_s20  ;;  %p1275_p8 = scmp.lt.u32.totalorder %s1711_s23, %s1765_s5 }
 0x4a4   : > { %p1276_p12 = scmp.lt.u32.totalorder %s1274_s14, %s1270_s20  ;;  %p1278_p2 = scmp.lt.u32.totalorder %s1270_s20, %s1711_s23 }
 0x4a5   : > { %p1272_p6 = pnand %p1271_p3, %p1812_p13 }
 0x4a6   : > { %p1277_p1 = por %p1276_p12, %p1275_p8 }
 0x4a7   : > { %p1273_p9 = pneg %p1272_p6 }
 0x4a8   : > { %p1279_p11 = por %p1278_p2, %p1277_p1 }
 0x4aa   : > { %p1280_p0 = pnand %p1279_p11, %p1273_p9 }
 0x4ac   : > { %1283 = shalt.err (!%p1280_p0)
}
 0x4ad   : > { %1043 = dma.vmem_to_hbm [thread:$0]  (%p1812_p13), %s1713_s26, 128, %s1711_s23, %s794_s21  }
 0x4ae PF: > { %s1813_s13 = sld [smem:[#allocation20_spill]]  ;;  %s820_s7 = sand.u32 1, %s1326_s18  }
 0x4af   : > { %p1814_p5 = scmp.ne.s32.totalorder %s1798_s12, 0  ;;  %s821_s22 = scalar_lea.sflag [#allocation7], %s820_s7 }
 0x4b4   : > { %p1815_p10 = scmp.ge.s32.totalorder %s1813_s13, 2 }
 0x4b6   : > { %p1060_p7 = pnand %p1815_p10, %p1814_p5 }
 0x4b8   : > { %1321 = dma.done.wait (!%p1060_p7), %s821_s22, 128  }
 0x4b9   : > { %1323 = vsyncadd (!%p1060_p7), %s821_s22, 4294967168  ;;  %s25_s23 = sadd.s32 1, %s1813_s13   ;;  %s1816_s29 = sld [smem:[#allocation18_spill]] }
 0x4ba   : > { %p22_p4 = scmp.ge.s32.totalorder %s25_s23, 4   ;;  %s1817_s20 = sld [smem:[#allocation22_spill]] }
 0x4bb   : > { %s1818_s21 = sld [smem:[#allocation19_spill]]  ;;  %s1819_s22 = sld [smem:[#allocation21_spill]] }
 0x4bc   : > { %s1820_s18 = smov %s1330_s19  ;;  %24 = sbr.rel (!%p22_p4) target bundleno = 12 (0xc), region = 122 }
 0x4bf   : > { %s1821_s19 = smov %s1816_s29 }
 0x4c3   :  { %826 = vsyncpa [#allocation6], 1 }
 0x4c4   :  { %828 = vsyncpa [#allocation6 + $0x1], 1 }
 0x4c5   :  { %829 = vsyncpa [#allocation9], 1 }
 0x4c6   :  { %831 = vsyncpa [#allocation9 + $0x1], 1 }
 0x4c7   :  { %832 = vsyncpa [#allocation12], 1 }
 0x4c8   :  { %833 = vsyncpa [#allocation7], 1 }
 0x4c9   :  { %835 = vsyncpa [#allocation7 + $0x1], 1 }

// kernel: tpu_custom_call.1
= control target key start
LH: loop header
LB: loop body
LE: loop exit
PB: predicated region body
PF: predicated region fallthrough
CT: control target
= control target key end

     0   :  { %s1760_s0 = inlined_call_operand.hbm [shape: bf16[2,2,8,16], index: 0, kind: input, shape index: {}]   ;;  %s1761_s1 = inlined_call_operand.hbm [shape: bf16[2,2,8,16], index: 1, kind: input, shape index: {}]   ;;  %s1762_s2 = inlined_call_operand.hbm [shape: bf16[2,2,8,16], index: 2, kind: input, shape index: {}]   ;;  %s1763_s3 = inlined_call_operand.hbm [shape: bf16[2,16,32], index: 3, kind: input, shape index: {}]   ;;  %s1764_s4 = inlined_call_operand.vmem [shape: f32[1,32], index: 4, kind: input, shape index: {}]   ;;  %s1765_s5 = inlined_call_operand.hbm [shape: f32[2,8,32], index: 5, kind: output, shape index: {}]  }
   0x1   :  { %1785 = sst [smem:[#allocation23_spill]] %s1760_s0 }
   0x2   :  { %1786 = sst [smem:[#allocation24_spill]] %s1761_s1 }
   0x3   :  { %10 = vsyncpa [#allocation6], 0 }
   0x4   :  { %12 = vsyncpa [#allocation6 + $0x1], 0 }
   0x5   :  { %13 = vsyncpa [#allocation9], 0 }
   0x6   :  { %15 = vsyncpa [#allocation9 + $0x1], 0 }
   0x7   :  { %16 = vsyncpa [#allocation12], 0 }
   0x8   :  { %17 = vsyncpa [#allocation7], 0 }
   0x9   :  { %19 = vsyncpa [#allocation7 + $0x1], 0  ;;  %s1389_s18 = smov 0   ;;  %s1391_s19 = smov 0  }
   0xa   :  { %s1393_s20 = smov 0   ;;  %s1395_s21 = smov 0  }
   0xb   :  { %s1397_s22 = smov 0   ;;  %s1399_s23 = smov 0  }
   0xc LB: > { %1787 = sst [smem:[#allocation18_spill]] %s1334_s20  ;;  %s44_s24 = sadd.s32 1, %s1342_s22  ;;  %s1346_s23 = sphi %s1399_s23, %s25_s23   ;;  %s1342_s22 = sphi %s1397_s22, %s1819_s22   ;;  %s1338_s21 = sphi %s1395_s21, %s1818_s21   ;;  %s1334_s20 = sphi %s1393_s20, %s1817_s20   ;;  %s1330_s19 = sphi %s1391_s19, %s1821_s19   ;;  %s1326_s18 = sphi %s1389_s18, %s1820_s18  }
   0xd   : > { %1788 = sst [smem:[#allocation19_spill]] %s1342_s22  ;;  %s53_s25 = sadd.s32 1, %s1334_s20 }
   0xe   : > { %1789 = sst [smem:[#allocation20_spill]] %s1346_s23  ;;  %p46_p0 = scmp.ge.s32.totalorder %s44_s24, 2 }
   0xf   : > { %p1766_p1 = scmp.ne.s32.totalorder %s1334_s20, %s1330_s19  ;;  %p61_p2 = scmp.eq.s32.totalorder %s1346_s23, 0 }
  0x10   : > { %s1823_s24 = smov (%p46_p0, %s44_s24), 0  ;;  %p1064_p6 = scmp.lt.s32.totalorder %s1346_s23, 2 }
  0x11   : > { %1790 = sst [smem:[#allocation21_spill]] %s1823_s24  ;;  %p62_p3 = por %p61_p2, %p1766_p1 }
  0x12   : > { %s48_s26 = ssub.s32 %s1342_s22, %s1823_s24  ;;  %s1771_s27 = sand.u32 1, %s1334_s20  }
  0x13   : > { %p51_p5 = scmp.eq.s32.totalorder %s48_s26, 0  ;;  %s1435_s28 = sshll.u32 %s1342_s22, 7 }
  0x14   : > { %s1442_s30 = sshll.u32 %s1771_s27, 3  ;;  %p1444_p7 = pnand %p1064_p6, %p62_p3 }
  0x15   : > { %s1438_s29 = scalar_select %p51_p5, %s1334_s20, %s53_s25  }
  0x16   : > { %s1792_s6 = scalar_select %p1444_p7, 1, 0 }
  0x17   : > { %1791 = sst [smem:[#allocation22_spill]] %s1438_s29  ;;  %s254_s7 = sand.u32 1, %s1346_s23  }
  0x18   : > { %s1793_s1 = sld [smem:[#allocation24_spill]]  ;;  %s258_s11 = scalar_lea.vmem [#allocation8], %s1442_s30 }
  0x19   : > { %s266_s12 = sshll.u32 %s258_s11, 4  ;;  %s1458_s13 = scalar_lea.sflag [#allocation9], %s254_s7  ;;  %s1456_s12 = int_to_ptr.vmem [resolvable:$true] %s266_s12 }
  0x1a   : > { %p1464_p9 = pneg %p1444_p7 }
  0x1c   : > { %s1794_s15 = scalar_select %p1464_p9, 1, 0 }
  0x1e   : > { %s1453_s10 = scalar_lea.hbm %s1793_s1, %s1435_s28  ;;  %s1143_s25 = scalar_lea.hbm %s1793_s1, 256 }
  0x1f   : > { %s1138_s14 = scalar_lea.hbm %s1453_s10, 128  ;;  %p1144_p12 = scmp.lt.u32.totalorder %s1453_s10, %s1793_s1 }
  0x20   : > { %p1139_p8 = scmp.ne.s32.totalorder %s1453_s10, %s1138_s14  ;;  %p1145_p13 = scmp.lt.u32.totalorder %s1143_s25, %s1138_s14 }
  0x21   : > { %p1147_p2 = scmp.lt.u32.totalorder %s1138_s14, %s1453_s10 }
  0x22   : > { %p1141_p10 = pnand %p1464_p9, %p1139_p8  ;;  %p1146_p0 = por %p1145_p13, %p1144_p12 }
  0x24   : > { %p1142_p11 = pneg %p1141_p10  ;;  %p1148_p3 = por %p1147_p2, %p1146_p0 }
  0x26   : > { %p1149_p5 = pnand %p1148_p3, %p1142_p11 }
  0x28   : > { %1152 = shalt.err (!%p1149_p5)
}
  0x29   : > { %s1153_s7 = scalar_lea.vmem %s1456_s12, 128  ;;  %s1348_s9 = smov [#allocation8]  }
  0x2a   : > { %p1154_p6 = scmp.ne.s32.totalorder %s1456_s12, %s1153_s7  ;;  %s1158_s11 = sshll.u32 %s1348_s9, 4  ;;  %s1159_s11 = int_to_ptr.vmem [resolvable:$false] %s1158_s11 }
  0x2b   : > { %s1160_s16 = scalar_lea.vmem %s1159_s11, 256  ;;  %p1161_p4 = scmp.lt.s32.totalorder %s1456_s12, %s1159_s11 }
  0x2c   : > { %p1156_p8 = pnand %p1154_p6, %p1464_p9  ;;  %p1162_p1 = scmp.lt.s32.totalorder %s1160_s16, %s1153_s7 }
  0x2e   : > { %p1157_p10 = pneg %p1156_p8  ;;  %p1163_p12 = por %p1162_p1, %p1161_p4 }
  0x30   : > { %p1164_p13 = pnand %p1163_p12, %p1157_p10 }
  0x32   : > { %1167 = shalt.err (!%p1164_p13)
}
  0x33   : > { %s1767_s14 = smov 64   ;;  %s1769_s17 = smov 4  }
  0x34   : > { %1055 = dma.hbm_to_vmem [thread:$0]  (!%p1444_p7), %s1453_s10, 128, %s1456_s12, %s1458_s13, %s1767_s14, %s1767_s14, %s1769_s17  }
  0x35   : > { %s1492_s25 = sadd.s32 4294967295, %s1346_s23   ;;  %s950_s26 = sadd.s32 4294967294, %s1346_s23  }
  0x36   : > { %p66_p1 = scmp.ne.s32.totalorder %s1330_s19, %s1326_s18  ;;  %p1776_p4 = scmp.eq.s32.totalorder %s1492_s25, 0 }
  0x37   : > { %p190_p11 = scmp.eq.s32.totalorder %s1492_s25, 1  ;;  %p196_p0 = scmp.eq.s32.totalorder %s950_s26, 1 }
  0x38   : > { %p951_p2 = scmp.ge.s32.totalorder %s1346_s23, 1  ;;  %p1502_p3 = por %p1776_p4, %p66_p1 }
  0x39   : > { %p1796_p5 = scmp.ne.s32.totalorder %s1334_s20, %s1330_s19  ;;  %p1513_p8 = por %p196_p0, %p66_p1 }
  0x3a   : > { %s1795_s8 = scalar_select %p1502_p3, 1, 0 }
  0x3b   : > { %p1509_p6 = por %p190_p11, %p1796_p5  ;;  %p203_p10 = scmp.lt.s32.totalorder %s1346_s23, 3 }
  0x3c   : > { %s1798_s12 = scalar_select %p1513_p8, 1, 0 }
  0x3d   : > { %s1797_s10 = scalar_select %p1509_p6, 1, 0 }
  0x3e   : > { %p1518_p12 = pnand %p951_p2, %p203_p10  ;;  %s1351_s9 = smov [#allocation11]  }
  0x3f   : > { %s215_s11 = sshll.u32 %s1351_s9, 4  ;;  %s1800_s0 = sld [smem:[#allocation23_spill]]  ;;  %s1522_s11 = int_to_ptr.vmem [resolvable:$true] %s215_s11 }
  0x40   : > { %s1799_s7 = scalar_select %p1518_p12, 1, 0 }
  0x41   : > { %p1045_p13 = pneg %p1518_p12  ;;  %s236_s17 = scalar_lea.vmem [#allocation5], %s1442_s30 }
  0x42   : > { %s244_s27 = sshll.u32 %s236_s17, 4  ;;  %s1802_s9 = sand.u32 1, %s1334_s20   ;;  %s1539_s27 = int_to_ptr.vmem [resolvable:$true] %s244_s27 }
  0x43   : > { %p1535_p1 = pnand %p1045_p13, %p1776_p4  ;;  %s1543_s24 = scalar_lea.sflag [#allocation6], %s1802_s9 }
  0x45   : > { %s1530_s14 = scalar_lea.hbm %s1800_s0, %s1435_s28  ;;  %s1173_s29 = scalar_lea.hbm %s1800_s0, 256 }
  0x46   : > { %s1801_s1 = scalar_select %p1535_p1, 1, 0 }
  0x47   : > { %s1168_s22 = scalar_lea.hbm %s1530_s14, 128  ;;  %p1174_p5 = scmp.lt.u32.totalorder %s1530_s14, %s1800_s0 }
  0x48   : > { %p1169_p11 = scmp.ne.s32.totalorder %s1530_s14, %s1168_s22  ;;  %p1175_p10 = scmp.lt.u32.totalorder %s1173_s29, %s1168_s22 }
  0x49   : > { %p1177_p4 = scmp.lt.u32.totalorder %s1168_s22, %s1530_s14 }
  0x4a   : > { %p1171_p0 = pnand %p1169_p11, %p1464_p9  ;;  %p1176_p13 = por %p1175_p10, %p1174_p5 }
  0x4c   : > { %p1172_p2 = pneg %p1171_p0  ;;  %p1178_p8 = por %p1177_p4, %p1176_p13 }
  0x4e   : > { %p1179_p6 = pnand %p1178_p8, %p1172_p2 }
  0x50   : > { %1182 = shalt.err (!%p1179_p6)
}
  0x51   : > { %s1183_s9 = scalar_lea.vmem %s1539_s27, 128  ;;  %s1352_s16 = smov [#allocation5]  }
  0x52   : > { %p1184_p11 = scmp.ne.s32.totalorder %s1539_s27, %s1183_s9  ;;  %s1188_s26 = sshll.u32 %s1352_s16, 4  ;;  %s1189_s26 = int_to_ptr.vmem [resolvable:$false] %s1188_s26 }
  0x53   : > { %s1190_s23 = scalar_lea.vmem %s1189_s26, 256  ;;  %p1191_p12 = scmp.lt.s32.totalorder %s1539_s27, %s1189_s26 }
  0x54   : > { %p1186_p0 = pnand %p1184_p11, %p1464_p9  ;;  %p1192_p1 = scmp.lt.s32.totalorder %s1190_s23, %s1183_s9 }
  0x56   : > { %p1187_p3 = pneg %p1186_p0  ;;  %p1193_p5 = por %p1192_p1, %p1191_p12 }
  0x58   : > { %p1194_p10 = pnand %p1193_p5, %p1187_p3 }
  0x5a   : > { %1197 = shalt.err (!%p1194_p10)
}
  0x5b   : > { %s1803_s22 = smov 4   ;;  %s1804_s29 = smov 64  }
  0x5c   : > { %1052 = dma.hbm_to_vmem [thread:$0]  (!%p1444_p7), %s1530_s14, 128, %s1539_s27, %s1543_s24, %s1804_s29, %s1804_s29, %s1803_s22  }
  0x5d   : > { %s1198_s16 = scalar_lea.hbm %s1763_s3, 256  ;;  %p1805_p3 = scmp.ne.s32.totalorder %s1801_s1, 0 }
  0x5e   : > { %p1199_p4 = scmp.ne.s32.totalorder %s1763_s3, %s1198_s16  ;;  %p1205_p1 = scmp.lt.u32.totalorder %s1198_s16, %s1763_s3 }
  0x5f   : > { %p1200_p6 = pneg %p1805_p3 }
  0x61   : > { %p1201_p8 = pnand %p1200_p6, %p1199_p4 }
  0x63   : > { %p1202_p12 = pneg %p1201_p8 }
  0x65   : > { %p1207_p2 = pnand %p1205_p1, %p1202_p12 }
  0x67   : > { %1210 = shalt.err (!%p1207_p2)
}
  0x68   : > { %s1211_s24 = scalar_lea.vmem %s1522_s11, 256  ;;  %p1219_p5 = scmp.lt.s32.totalorder %s1522_s11, %s1522_s11 }
  0x69   : > { %p1212_p13 = scmp.ne.s32.totalorder %s1522_s11, %s1211_s24  ;;  %p1220_p10 = scmp.lt.s32.totalorder %s1211_s24, %s1211_s24 }
  0x6b   : > { %p1214_p11 = pnand %p1212_p13, %p1200_p6  ;;  %p1221_p7 = por %p1220_p10, %p1219_p5 }
  0x6d   : > { %p1215_p0 = pneg %p1214_p11 }
  0x6f   : > { %p1222_p9 = pnand %p1221_p7, %p1215_p0 }
  0x71   : > { %1225 = shalt.err (!%p1222_p9)
}
  0x72   : > { %1048 = dma.hbm_to_vmem [thread:$0]  (!%p1805_p3), %s1763_s3, 256, %s1522_s11, [#allocation12], %s1804_s29, %s1804_s29, %s1803_s22  }
  0x73   : > { %s1598_s17 = scalar_lea.hbm %s1762_s2, %s1435_s28  ;;  %s280_s1 = scalar_lea.vmem [#allocation10], %s1442_s30 }
  0x74   : > { %s288_s16 = sshll.u32 %s280_s1, 4  ;;  %s1226_s26 = scalar_lea.hbm %s1598_s17, 128  ;;  %s1601_s16 = int_to_ptr.vmem [resolvable:$true] %s288_s16 }
  0x75   : > { %p1227_p7 = scmp.ne.s32.totalorder %s1598_s17, %s1226_s26  ;;  %p1806_p9 = scmp.ne.s32.totalorder %s1794_s15, 0 }
  0x76   : > { %s1231_s23 = scalar_lea.hbm %s1762_s2, 256  ;;  %p1232_p3 = scmp.lt.u32.totalorder %s1598_s17, %s1762_s2 }
  0x77   : > { %p1229_p4 = pnand %p1227_p7, %p1806_p9  ;;  %p1233_p8 = scmp.lt.u32.totalorder %s1231_s23, %s1226_s26 }
  0x78   : > { %p1235_p1 = scmp.lt.u32.totalorder %s1226_s26, %s1598_s17 }
  0x79   : > { %p1230_p6 = pneg %p1229_p4  ;;  %p1234_p12 = por %p1233_p8, %p1232_p3 }
  0x7b   : > { %p1236_p2 = por %p1235_p1, %p1234_p12 }
  0x7d   : > { %p1237_p13 = pnand %p1236_p2, %p1230_p6 }
  0x7f   : > { %1240 = shalt.err (!%p1237_p13)
}
  0x80   : > { %s1241_s30 = scalar_lea.vmem %s1601_s16, 128  ;;  %s1353_s0 = smov [#allocation10]  }
  0x81   : > { %p1242_p11 = scmp.ne.s32.totalorder %s1601_s16, %s1241_s30  ;;  %s1246_s20 = sshll.u32 %s1353_s0, 4  ;;  %s1247_s20 = int_to_ptr.vmem [resolvable:$false] %s1246_s20 }
  0x82   : > { %s1248_s27 = scalar_lea.vmem %s1247_s20, 256  ;;  %p1249_p10 = scmp.lt.s32.totalorder %s1601_s16, %s1247_s20 }
  0x83   : > { %p1244_p0 = pnand %p1242_p11, %p1806_p9  ;;  %p1250_p7 = scmp.lt.s32.totalorder %s1248_s27, %s1241_s30 }
  0x85   : > { %p1245_p5 = pneg %p1244_p0  ;;  %p1251_p4 = por %p1250_p7, %p1249_p10 }
  0x87   : > { %p1252_p3 = pnand %p1251_p4, %p1245_p5 }
  0x89   : > { %1255 = shalt.err (!%p1252_p3)
}
  0x8a   : > { %p1807_p6 = scmp.ne.s32.totalorder %s1792_s6, 0  ;;  %p1808_p9 = scmp.ne.s32.totalorder %s1799_s7, 0 }
  0x8b   : > { %s1631_s15 = sand.u32 (!%p1808_p9), 1, %s1330_s19   ;;  %p1809_p8 = scmp.ne.s32.totalorder (!%p1808_p9), %s1795_s8, 0 }
  0x8c   : > { %1058 = dma.hbm_to_vmem [thread:$0]  (!%p1807_p6), %s1598_s17, 128, %s1601_s16, %s1458_s13, %s1804_s29, %s1804_s29, %s1803_s22  }
  0x8d   : > { %300 = sbr.rel (%p1808_p9) target bundleno = 1198 (0x4ae), region = 40  ;;  %s1634_s14 = sshll.u32 (!%p1808_p9), %s1631_s15, 3 }
  0x8e   : > { %s303_s6 = scalar_lea.sflag (!%p1808_p9), [#allocation6], %s1631_s15  ;;  %s306_s1 = scalar_lea.vmem (!%p1808_p9), [#allocation5], %s1634_s14 }
  0x94   : > { %1309 = dma.done.wait (%p1809_p8), %s303_s6, 128  }
  0x95   : > { %1311 = vsyncadd (%p1809_p8), %s303_s6, 4294967168  ;;  %s311_s13 = sand.u32 1, %s1492_s25   ;;  %s315_s22 = scalar_lea.vmem [#allocation8], %s1634_s14 }
  0x96   : > { %s312_s7 = scalar_lea.sflag [#allocation9], %s311_s13 }
  0x97   : > { %1313 = dma.done.wait (%p1809_p8), %s312_s7, 256  }
  0x98   : > { %1315 = vsyncadd (%p1809_p8), %s312_s7, 4294967040  ;;  %s324_s29 = scalar_lea.vmem [#allocation10], %s1634_s14  ;;  %p1810_p12 = scmp.eq.s32.totalorder %s1492_s25, 0 }
  0x9a   : > { %1317 = dma.done.wait (%p1810_p12), [#allocation12], 256   ;;  %p1811_p1 = pmov %p1810_p12 }
  0x9b   : > { %vm375_vm0 = vcmask 130048   ;;  %v1354_v0 = vmov 0.0   ;;  %vm1355_vm1 = vmmov 0   ;;  %v380_v1 = vld [vmem:[%s315_s22] sm:$0xf]  ;;  %vm370_vm2 = vcmask 7168  }
  0x9c   : > { %1319 = vsyncadd (%p1811_p1), [#allocation12], 4294967040  ;;  %997 = vmatprep.subr.bf16.mxu0 %v1354_v0  ;;  %376 = vst.msk [vmem:[#allocation4] sm:$0xff] %vm375_vm0, %v1354_v0  ;;  %1003 = vmatprep.subr.bf16.mxu1 %v1354_v0  ;;  %v381_v2 = vld [vmem:[%s315_s22 + $0x4] sm:$0xf]  ;;  %v389_v3 = vsel %vm375_vm0, %v380_v1, 0  ;;  %v479_v8 = vlaneseq }
  0x9d   : > { %377 = vst.msk [vmem:[#allocation4 + $0x8] sm:$0xff] %vm375_vm0, %v1354_v0  ;;  %999 = vmatprep.mubr.msk.bf16.mxu0 %vm1355_vm1, %v1354_v0  ;;  %1005 = vmatprep.mubr.msk.bf16.mxu1 %vm1355_vm1, %v1354_v0  ;;  %v435_v4 = vsel %vm375_vm0, %v381_v2, 0  ;;  %v378_v5 = vld [vmem:[%s306_s1] sm:$0xf]  ;;  %v379_v6 = vld [vmem:[%s306_s1 + $0x4] sm:$0xf] }
  0x9e   : > { %998 = vmatpush3.bf16.xpose.msra.mxu0 %v389_v3  ;;  %1004 = vmatpush3.bf16.xpose.msra.mxu1 %v435_v4  ;;  %v1356_v7 = vmov -inf   ;;  %373 = vst.msk [vmem:[#allocation3] sm:$0xff] %vm370_vm2, %v1354_v0  ;;  %374 = vst.msk [vmem:[#allocation3 + $0x8] sm:$0xff] %vm370_vm2, %v1354_v0  ;;  %v480_v9 = vshrl.u32 %v479_v8, 7  ;;  %v484_v10 = vand.u32 127, %v479_v8  ;;  %vm496_vm4 = vcmask 64512  }
  0x9f   : > { %1009 = vmatprep.subr.bf16.mxu0 %v1354_v0  ;;  %1015 = vmatprep.subr.bf16.mxu1 %v1354_v0  ;;  %371 = vst.msk [vmem:[#allocation2] sm:$0xff] %vm370_vm2, %v1356_v7  ;;  %372 = vst.msk [vmem:[#allocation2 + $0x8] sm:$0xff] %vm370_vm2, %v1356_v7  ;;  %v1357_v25 = vmov 0   ;;  %v382_v34 = vld [vmem:[%s324_s29] sm:$0xf]  ;;  %vm547_vm5 = vcmask 1043456  }
  0xa0   : > { %vm487_vm3 = vcmp.ge.s32.totalorder %v480_v9, %v484_v10  ;;  %1122 = vset.pattern.permute.xlu1 %v1357_v25  ;;  %1123 = vset.pattern.permute.xlu0 %v1357_v25  ;;  %v549_v35 = vsel %vm547_vm5, %v382_v34, 0  ;;  %v383_v36 = vld [vmem:[%s324_s29 + $0x4] sm:$0xf]  ;;  %v1125_v1 = vld [vmem:[#allocation11] sm:$0xff]   ;;  %v1124_v2 = vld [vmem:[#allocation11 + $0x8] sm:$0xff]   ;;  %s979_s17 = sshll.u32 %s1338_s21, 7 }
  0xa1   : > { %v595_v37 = vsel %vm547_vm5, %v383_v36, 0  ;;  %s364_s16 = scalar_lea.vmem [#allocation13], %s1634_s14  ;;  %vm791_vm6 = vcmask 261120   ;;  %s1711_s23 = scalar_lea.hbm %s1765_s5, %s979_s17 }
  0xa2   : > { %s808_s26 = sshll.u32 %s364_s16, 4  ;;  %s794_s21 = scalar_lea.sflag [#allocation7], %s1631_s15  ;;  %s1713_s26 = int_to_ptr.vmem [resolvable:$true] %s808_s26 }
  0xa3   : > { %v637_v4 = vld [vmem:[#allocation4] sm:$0xff]  ;;  %s1256_s24 = scalar_lea.vmem %s1713_s26, 128  ;;  %p1812_p13 = scmp.ne.s32.totalorder %s1797_s10, 0 }
  0xa4   : > { %v638_v7 = vld [vmem:[#allocation4 + $0x8] sm:$0xff]  ;;  %p1257_p2 = scmp.ne.s32.totalorder %s1713_s26, %s1256_s24  ;;  %s1358_s28 = smov [#allocation13]  }
  0xa5   : > { %1000 = vmatmul.mubr.msk.bf16.vlgmr.msra.gmra.mrb[0].mxu0 %vm375_vm0, %v378_v5  ;;  %1006 = vmatmul.mubr.msk.bf16.vlgmr.msra.gmra.mrb[0].mxu1 %vm375_vm0, %v379_v6  ;;  %v527_v54 = vld [vmem:[#allocation3] sm:$0xff]  ;;  %v528_v57 = vld [vmem:[#allocation3 + $0x8] sm:$0xff]  ;;  %s1260_s30 = sshll.u32 %s1358_s28, 4  ;;  %s1261_s30 = int_to_ptr.vmem [resolvable:$false] %s1260_s30 }
  0xa6   : > { %1011 = vmatprep.mubr.msk.bf16.mxu0 %vm1355_vm1, %v1354_v0  ;;  %1017 = vmatprep.mubr.msk.bf16.mxu1 %vm1355_vm1, %v1354_v0  ;;  %v494_v26 = vld [vmem:[#allocation2] sm:$0xff]  ;;  %v495_v29 = vld [vmem:[#allocation2 + $0x8] sm:$0xff]  ;;  %p1258_p11 = pnand %p1257_p2, %p1812_p13  ;;  %s1262_s0 = scalar_lea.vmem %s1261_s30, 256 }
  0xa7   : > { %1010 = vmatpush3.bf16.msra.mxu0 %v549_v35  ;;  %1016 = vmatpush3.bf16.msra.mxu1 %v595_v37  ;;  %p1263_p5 = scmp.lt.s32.totalorder %s1713_s26, %s1261_s30  ;;  %p1264_p10 = scmp.lt.s32.totalorder %s1262_s0, %s1256_s24 }
  0xa8   : > { %1021 = vmatprep.subr.bf16.mxu0 %v1354_v0  ;;  %1027 = vmatprep.subr.bf16.mxu1 %v1354_v0  ;;  %p1259_p0 = pneg %p1258_p11 }
  0xa9   : > { %p1265_p7 = por %p1264_p10, %p1263_p5 }
  0xab   : > { %p1266_p4 = pnand %p1265_p7, %p1259_p0 }
 0x178   : > { %v425_v11 = vpop.f32.mrb[0].mxu0  ;;  %v471_v12 = vpop.f32.mrb[0].mxu1 }
 0x179   : > { %v490_v13 = vsel %vm487_vm3, %v425_v11, -1e+20  ;;  %v1001_v14 = vpop.f32.mrb[1].mxu0  ;;  %v491_v15 = vsel %vm487_vm3, %v471_v12, -1e+20  ;;  %v1007_v16 = vpop.f32.mrb[1].mxu1 }
 0x17a   : > { %v492_v17 = vmul.f32 0.17677669, %v490_v13  ;;  %v493_v18 = vmul.f32 0.17677669, %v491_v15  ;;  %v428_v19 = vpop.f32.mrb[2].mxu0  ;;  %v474_v20 = vpop.f32.mrb[2].mxu1 }
 0x17b   : > { %v1002_v21 = vpop.f32.mrb[3].mxu0  ;;  %v1008_v22 = vpop.f32.mrb[3].mxu1 }
 0x17c   : > { %v497_v23 = vsel %vm496_vm4, %v492_v17, -inf  ;;  %v500_v24 = vsel %vm496_vm4, %v493_v18, -inf }
 0x17d   : > { %498 = vmax.xlane.f32.xlu0 %v497_v23 }
 0x181   : > { %501 = vmax.xlane.f32.xlu0 %v500_v24 }
 0x20a   : > { %v499_v27 = vpop.xlane.xlu0 %498 }
 0x20b   : > { %v503_v28 = vmax.f32 %v494_v26, %v499_v27 }
 0x20d   : > { %v505_v30 = vsub.f32 %v494_v26, %v503_v28  ;;  %655 = vst.msk [vmem:[#allocation2] sm:$0xff] %vm370_vm2, %v503_v28  ;;  %513 = vperm.xlu1 %1122, %v503_v28  }
 0x20e   : > { %v502_v31 = vpop.xlane.xlu0 %501 }
 0x20f   : > { %v504_v32 = vmax.f32 %v495_v29, %v502_v31  ;;  %v507_v51 = vmul.f32 1.442695, %v505_v30 }
 0x211   : > { %v506_v33 = vsub.f32 %v495_v29, %v504_v32  ;;  %656 = vst.msk [vmem:[#allocation2 + $0x8] sm:$0xff] %vm370_vm2, %v504_v32  ;;  %518 = vperm.xlu1 %1122, %v504_v32  }
 0x213   : > { %v509_v50 = vmul.f32 1.442695, %v506_v33  ;;  %v977_v33 = vld [vmem:[%s1764_s4] ss:$0 sm:$0xff] }
 0x28c   : > { %v514_v38 = vpop.permute.xlu1 %513 }
 0x28d   : > { %v521_v39 = vsub.f32 %v492_v17, %v514_v38 }
 0x28f   : > { %v523_v40 = vmul.f32 1.442695, %v521_v39 }
 0x290   : > { %v519_v41 = vpop.permute.xlu1 %518 }
 0x291   : > { %1126 = vpow2.f32 %v523_v40  ;;  %v522_v42 = vsub.f32 %v493_v18, %v519_v41 }
 0x293   : > { %v525_v43 = vmul.f32 1.442695, %v522_v42 }
 0x295   : > { %1128 = vpow2.f32 %v525_v43 }
 0x296   : > { %1130 = vpow2.f32 %v509_v50 }
 0x297   : > { %1132 = vpow2.f32 %v507_v51 }
 0x29b   : > { %v1127_v44 = vpop.eup %1126 }
 0x29c   : > { %v531_v45 = vsel %vm496_vm4, %v1127_v44, 0.0  ;;  %v542_v46 = vpack.c.bf16 %v1127_v44, %v1127_v44 }
 0x29d   : > { %532 = vadd.xlane.f32.xlu0 %v531_v45 }
 0x29e   : > { %1012 = vmatmul.mubr.msk.bf16.vlgmr.msra.gmra.mrb[4].mxu0 %vm496_vm4, %v542_v46 }
 0x29f   : > { %v1129_v47 = vpop.eup %1128  ;;  %1023 = vmatprep.mubr.msk.bf16.mxu0 %vm1355_vm1, %v1354_v0  ;;  %1022 = vmatpush3.bf16.msra.mxu0 %v1124_v2 }
 0x2a0   : > { %v534_v48 = vsel %vm496_vm4, %v1129_v47, 0.0  ;;  %v543_v49 = vpack.c.bf16 %v1129_v47, %v1129_v47  ;;  %v1131_v52 = vpop.eup %1130 }
 0x2a1   : > { %535 = vadd.xlane.f32.xlu1 %v534_v48  ;;  %v1133_v53 = vpop.eup %1132  ;;  %v530_v59 = vmul.f32 %v1131_v52, %v528_v57 }
 0x2a2   : > { %1018 = vmatmul.mubr.msk.bf16.vlgmr.msra.gmra.mrb[4].mxu1 %vm496_vm4, %v543_v49  ;;  %v529_v55 = vmul.f32 %v1133_v53, %v527_v54 }
 0x2a3   : > { %1029 = vmatprep.mubr.msk.bf16.mxu1 %vm1355_vm1, %v1354_v0  ;;  %1028 = vmatpush3.bf16.msra.mxu1 %v1125_v1 }
 0x2b2   : > { %646 = vperm.xlu1 %1122, %v1131_v52  }
 0x2b3   : > { %641 = vperm.xlu0 %1123, %v1133_v53  }
 0x32a   : > { %v533_v56 = vpop.xlane.xlu0 %532 }
 0x32b   : > { %v537_v58 = vadd.f32 %v533_v56, %v529_v55 }
 0x32d   : > { %540 = vst.msk [vmem:[#allocation3] sm:$0xff] %vm370_vm2, %v537_v58 }
 0x32e   : > { %v536_v60 = vpop.xlane.xlu1 %535 }
 0x32f   : > { %v538_v61 = vadd.f32 %v536_v60, %v530_v59 }
 0x331   : > { %541 = vst.msk [vmem:[#allocation3 + $0x8] sm:$0xff] %vm370_vm2, %v538_v61 }
 0x332   : > { %v642_v5 = vpop.permute.xlu0 %641  ;;  %v647_v8 = vpop.permute.xlu1 %646 }
 0x333   : > { %v649_v6 = vmul.f32 %v642_v5, %v637_v4  ;;  %v650_v13 = vmul.f32 %v647_v8, %v638_v7 }
 0x334   : > { %v662_v62 = vld [vmem:[#allocation3] sm:$0xff] }
 0x335   : > { %1134 = vrcp.f32 %v662_v62 }
 0x338   : > { %v663_v63 = vld [vmem:[#allocation3 + $0x8] sm:$0xff] }
 0x339   : > { %1136 = vrcp.f32 %v663_v63 }
 0x33f   : > { %v1135_v0 = vpop.eup %1134 }
 0x340   : > { %668 = vperm.xlu0 %1123, %v1135_v0  }
 0x343   : > { %v1137_v3 = vpop.eup %1136 }
 0x344   : > { %673 = vperm.xlu0 %1123, %v1137_v3  }
 0x371   : > { %v585_v9 = vpop.f32.mrb[4].mxu0 }
 0x372   : > { %v651_v10 = vadd.f32 %v649_v6, %v585_v9  ;;  %v1013_v11 = vpop.f32.mrb[5].mxu0 }
 0x373   : > { %v588_v12 = vpop.f32.mrb[6].mxu0 }
 0x374   : > { %653 = vst.msk [vmem:[#allocation4] sm:$0xff] %vm375_vm0, %v651_v10  ;;  %v1014_v14 = vpop.f32.mrb[7].mxu0 }
 0x375   : > { %v631_v15 = vpop.f32.mrb[4].mxu1 }
 0x376   : > { %v652_v16 = vadd.f32 %v650_v13, %v631_v15  ;;  %v1019_v17 = vpop.f32.mrb[5].mxu1 }
 0x377   : > { %v634_v18 = vpop.f32.mrb[6].mxu1 }
 0x378   : > { %654 = vst.msk [vmem:[#allocation4 + $0x8] sm:$0xff] %vm375_vm0, %v652_v16  ;;  %v1020_v19 = vpop.f32.mrb[7].mxu1 }
 0x37b   : > { %v660_v20 = vld [vmem:[#allocation4] sm:$0xff] }
 0x37f   : > { %v661_v24 = vld [vmem:[#allocation4 + $0x8] sm:$0xff] }
 0x3bf   : > { %v669_v21 = vpop.permute.xlu0 %668 }
 0x3c0   : > { %v676_v22 = vmul.f32 %v669_v21, %v660_v20 }
 0x3c2   : > { %v678_v23 = vpack.c.bf16 %v676_v22, %v676_v22 }
 0x3c3   : > { %v674_v25 = vpop.permute.xlu0 %673 }
 0x3c4   : > { %v677_v26 = vmul.f32 %v674_v25, %v661_v24  ;;  %1030 = vmatmul.mubr.msk.bf16.vlgmr.msra.gmra.mrb[8].mxu1 %vm375_vm0, %v678_v23 }
 0x3c6   : > { %v679_v27 = vpack.c.bf16 %v677_v26, %v677_v26 }
 0x3c8   : > { %1024 = vmatmul.mubr.msk.bf16.vlgmr.msra.gmra.mrb[8].mxu0 %vm375_vm0, %v679_v27 }
 0x497   : > { %v777_v28 = vpop.f32.mrb[8].mxu1 }
 0x498   : > { %v1031_v29 = vpop.f32.mrb[9].mxu1 }
 0x499   : > { %v780_v30 = vpop.f32.mrb[10].mxu1 }
 0x49a   : > { %v1032_v31 = vpop.f32.mrb[11].mxu1 }
 0x49b   : > { %v728_v32 = vpop.f32.mrb[8].mxu0 }
 0x49c   : > { %v778_v34 = vadd.f32 %v777_v28, %v728_v32  ;;  %v1025_v35 = vpop.f32.mrb[9].mxu0 }
 0x49d   : > { %v731_v36 = vpop.f32.mrb[10].mxu0 }
 0x49e   : > { %v790_v37 = vadd.f32 %v977_v33, %v778_v34  ;;  %v1026_v38 = vpop.f32.mrb[11].mxu0 }
 0x4a0   : > { %792 = vst.msk [vmem:[%s364_s16] sm:$0xff] %vm791_vm6, %v790_v37 }
 0x4a1   : > { %1269 = shalt.err (!%p1266_p4)
}
 0x4a2   : > { %s1270_s20 = scalar_lea.hbm %s1711_s23, 128  ;;  %s1274_s14 = scalar_lea.hbm %s1765_s5, 256 }
 0x4a3   : > { %p1271_p3 = scmp.ne.s32.totalorder %s1711_s23, %s1270_s20  ;;  %p1275_p8 = scmp.lt.u32.totalorder %s1711_s23, %s1765_s5 }
 0x4a4   : > { %p1276_p12 = scmp.lt.u32.totalorder %s1274_s14, %s1270_s20  ;;  %p1278_p2 = scmp.lt.u32.totalorder %s1270_s20, %s1711_s23 }
 0x4a5   : > { %p1272_p6 = pnand %p1271_p3, %p1812_p13 }
 0x4a6   : > { %p1277_p1 = por %p1276_p12, %p1275_p8 }
 0x4a7   : > { %p1273_p9 = pneg %p1272_p6 }
 0x4a8   : > { %p1279_p11 = por %p1278_p2, %p1277_p1 }
 0x4aa   : > { %p1280_p0 = pnand %p1279_p11, %p1273_p9 }
 0x4ac   : > { %1283 = shalt.err (!%p1280_p0)
}
 0x4ad   : > { %1043 = dma.vmem_to_hbm [thread:$0]  (%p1812_p13), %s1713_s26, 128, %s1711_s23, %s794_s21  }
 0x4ae PF: > { %s1813_s13 = sld [smem:[#allocation20_spill]]  ;;  %s820_s7 = sand.u32 1, %s1326_s18  }
 0x4af   : > { %p1814_p5 = scmp.ne.s32.totalorder %s1798_s12, 0  ;;  %s821_s22 = scalar_lea.sflag [#allocation7], %s820_s7 }
 0x4b4   : > { %p1815_p10 = scmp.ge.s32.totalorder %s1813_s13, 2 }
 0x4b6   : > { %p1060_p7 = pnand %p1815_p10, %p1814_p5 }
 0x4b8   : > { %1321 = dma.done.wait (!%p1060_p7), %s821_s22, 128  }
 0x4b9   : > { %1323 = vsyncadd (!%p1060_p7), %s821_s22, 4294967168  ;;  %s25_s23 = sadd.s32 1, %s1813_s13   ;;  %s1816_s29 = sld [smem:[#allocation18_spill]] }
 0x4ba   : > { %p22_p4 = scmp.ge.s32.totalorder %s25_s23, 4   ;;  %s1817_s20 = sld [smem:[#allocation22_spill]] }
 0x4bb   : > { %s1818_s21 = sld [smem:[#allocation19_spill]]  ;;  %s1819_s22 = sld [smem:[#allocation21_spill]] }
 0x4bc   : > { %s1820_s18 = smov %s1330_s19  ;;  %24 = sbr.rel (!%p22_p4) target bundleno = 12 (0xc), region = 122 }
 0x4bf   : > { %s1821_s19 = smov %s1816_s29 }
 0x4c3   :  { %826 = vsyncpa [#allocation6], 1 }
 0x4c4   :  { %828 = vsyncpa [#allocation6 + $0x1], 1 }
 0x4c5   :  { %829 = vsyncpa [#allocation9], 1 }
 0x4c6   :  { %831 = vsyncpa [#allocation9 + $0x1], 1 }
 0x4c7   :  { %832 = vsyncpa [#allocation12], 1 }
 0x4c8   :  { %833 = vsyncpa [#allocation7], 1 }
 0x4c9   :  { %835 = vsyncpa [#allocation7 + $0x1], 1 }

</bundles_post_ra>
